<compile_context>
chip_gen: v7x
topology: tpu7x:2x2x1
jax: 0.10.0
libtpu: 0.0.40
codegen_flags: <defaults>
</compile_context>

<pallas_src>
import math

import jax
import jax.numpy as jnp
from jax import lax
from jax.experimental import pallas as pl
from jax.experimental.pallas import tpu as pltpu

# Storage dtype for activations.  float32 preserves the PyTorch forward
# semantics exactly; set to jnp.bfloat16 on v6e/v7x for ~2x HBM/MXU throughput
# (all matmuls already accumulate in f32 via preferred_element_type).
ACT_DTYPE = jnp.float32

_TILE_ROWS = 512
_PAR = pltpu.CompilerParams(dimension_semantics=("parallel",))


def _pick_tile(m, target=_TILE_ROWS):
    """Largest row tile <= target that divides m and is a multiple of 8
    (falls back to the full extent, which is always a legal block)."""
    if m <= target:
        return m
    for d in range(target, 7, -1):
        if d % 8 == 0 and m % d == 0:
            return d
    return m


# ----------------------------------------------------------------------------
# Matmul (+bias / BN / act / L2 / fused head) kernels
# ----------------------------------------------------------------------------
def _postproc(y, act, l2norm):
    if act == "relu":
        y = jnp.maximum(y, 0.0)
    elif act == "sigmoid":
        y = jax.nn.sigmoid(y)
    if l2norm:  # torch: x / (||x|| + 1e-7); reciprocal runs on the EUP slot
        nrm = jnp.sqrt(jnp.sum(y * y, axis=-1, keepdims=True))
        y = y * pl.reciprocal(nrm + 1e-7, approx=True)
    return y


def _mm_bias_kernel(act):
    def kernel(x_ref, w_ref, b_ref, o_ref):
        y = jnp.dot(x_ref[...], w_ref[...], preferred_element_type=jnp.float32)
        y = y + b_ref[...]
        o_ref[...] = _postproc(y, act, False).astype(o_ref.dtype)
    return kernel


def _mm_bn_fused_kernel(act, l2norm, has_head, emit_main):
    # whole M in one tile: matmul + batch stats + BN + act (+ head) in one pass
    def kernel(*refs):
        x_ref, w_ref = refs[0], refs[1]
        outs = refs[4:] if has_head else refs[2:]
        y = jnp.dot(x_ref[...], w_ref[...], preferred_element_type=jnp.float32)
        mu = jnp.mean(y, axis=0, keepdims=True)
        var = jnp.mean(y * y, axis=0, keepdims=True) - mu * mu
        y = _postproc((y - mu) * lax.rsqrt(var + 1e-5), act, l2norm)
        k = 0
        if emit_main:
            outs[k][...] = y.astype(outs[k].dtype)
            k += 1
        if has_head:
            hw_ref, hb_ref = refs[2], refs[3]
            h = jnp.dot(y, hw_ref[...], preferred_element_type=jnp.float32) + hb_ref[...]
            outs[k][...] = h.astype(outs[k].dtype)
    return kernel


def _mm_stats_kernel(x_ref, w_ref, y_ref, stat_ref):
    # pass 1 of tiled BN: matmul + per-tile per-channel sum / sum-of-squares
    y = jnp.dot(x_ref[...], w_ref[...], preferred_element_type=jnp.float32)
    y_ref[...] = y.astype(y_ref.dtype)
    stat_ref[0:1, 0:1, :] = jnp.sum(y, axis=0, keepdims=True)[None]
    stat_ref[0:1, 1:2, :] = jnp.sum(y * y, axis=0, keepdims=True)[None]


def _bn_apply_kernel(act, l2norm, has_head, emit_main):
    # pass 2 of tiled BN: normalize with global stats + act (+ head)
    def kernel(*refs):
        y_ref, mean_ref, rstd_ref = refs[0], refs[1], refs[2]
        outs = refs[5:] if has_head else refs[3:]
        y = (y_ref[...].astype(jnp.float32) - mean_ref[...]) * rstd_ref[...]
        y = _postproc(y, act, l2norm)
        k = 0
        if emit_main:
            outs[k][...] = y.astype(outs[k].dtype)
            k += 1
        if has_head:
            hw_ref, hb_ref = refs[3], refs[4]
            h = jnp.dot(y, hw_ref[...], preferred_element_type=jnp.float32) + hb_ref[...]
            outs[k][...] = h.astype(outs[k].dtype)
    return kernel


def dense(x2d, w2d, b=None, *, use_bn=False, act="none", l2norm=False,
          head=None, emit_main=True):
    """Row-tiled matmul (1x1-conv style) with fused bias / training-mode BN /
    activation / per-row L2 norm / optional fused 1x1 head projection."""
    M, K = x2d.shape
    N = w2d.shape[1]
    tm = _pick_tile(M)
    nm = M // tm
    x2d = x2d.astype(ACT_DTYPE)
    w2d = w2d.astype(ACT_DTYPE)

    has_head = head is not None
    if has_head:
        hw = head["w"].reshape(-1, head["w"].shape[-1]).astype(jnp.float32)
        hb = head["b"].reshape(1, -1).astype(jnp.float32)
        Hc = hw.shape[1]

    def _outs():
        shapes, specs = [], []
        if emit_main:
            shapes.append(jax.ShapeDtypeStruct((M, N), ACT_DTYPE))
            specs.append(pl.BlockSpec((tm, N), lambda i: (i, 0)))
        if has_head:
            shapes.append(jax.ShapeDtypeStruct((M, Hc), ACT_DTYPE))
            specs.append(pl.BlockSpec((tm, Hc), lambda i: (i, 0)))
        if len(shapes) == 1:
            return shapes[0], specs[0]
        return tuple(shapes), tuple(specs)

    if not use_bn:
        assert emit_main and not has_head
        return pl.pallas_call(
            _mm_bias_kernel(act),
            grid=(nm,),
            in_specs=[pl.BlockSpec((tm, K), lambda i: (i, 0)),
                      pl.BlockSpec((K, N), lambda i: (0, 0)),
                      pl.BlockSpec((1, N), lambda i: (0, 0))],
            out_specs=pl.BlockSpec((tm, N), lambda i: (i, 0)),
            out_shape=jax.ShapeDtypeStruct((M, N), ACT_DTYPE),
            compiler_params=_PAR,
        )(x2d, w2d, b.reshape(1, N).astype(jnp.float32))

    # BN layers: conv bias (if any) is dropped, exactly cancelled by mean-sub.
    head_specs = ([pl.BlockSpec((N, Hc), lambda i: (0, 0)),
                   pl.BlockSpec((1, Hc), lambda i: (0, 0))] if has_head else [])
    head_args = [hw, hb] if has_head else []
    out_shape, out_specs = _outs()

    if nm == 1:
        return pl.pallas_call(
            _mm_bn_fused_kernel(act, l2norm, has_head, emit_main),
            grid=(1,),
            in_specs=[pl.BlockSpec((tm, K), lambda i: (i, 0)),
                      pl.BlockSpec((K, N), lambda i: (0, 0))] + head_specs,
            out_specs=out_specs, out_shape=out_shape,
            compiler_params=_PAR,
        )(x2d, w2d, *head_args)

    # Tiled two-pass BN.
    y, stats = pl.pallas_call(
        _mm_stats_kernel,
        grid=(nm,),
        in_specs=[pl.BlockSpec((tm, K), lambda i: (i, 0)),
                  pl.BlockSpec((K, N), lambda i: (0, 0))],
        out_specs=(pl.BlockSpec((tm, N), lambda i: (i, 0)),
                   pl.BlockSpec((1, 2, N), lambda i: (i, 0, 0))),
        out_shape=(jax.ShapeDtypeStruct((M, N), ACT_DTYPE),
                   jax.ShapeDtypeStruct((nm, 2, N), jnp.float32)),
        compiler_params=_PAR,
    )(x2d, w2d)
    s = jnp.sum(stats, axis=0)                       # tiny (2, N) reduction
    mean = s[0] / M
    rstd = lax.rsqrt(s[1] / M - mean * mean + 1e-5)
    return pl.pallas_call(
        _bn_apply_kernel(act, l2norm, has_head, emit_main),
        grid=(nm,),
        in_specs=[pl.BlockSpec((tm, N), lambda i: (i, 0)),
                  pl.BlockSpec((1, N), lambda i: (0, 0)),
                  pl.BlockSpec((1, N), lambda i: (0, 0))] + head_specs,
        out_specs=out_specs, out_shape=out_shape,
        compiler_params=_PAR,
    )(y, mean.reshape(1, N), rstd.reshape(1, N), *head_args)


# ----------------------------------------------------------------------------
# Elementwise / reduction kernels (row-tiled, broadcast done in-kernel)
# ----------------------------------------------------------------------------
def _softmax_kernel(x_ref, o_ref):
    x = x_ref[...].astype(jnp.float32)
    m = jnp.max(x, axis=-1, keepdims=True)
    e = jnp.exp(x - m)
    o_ref[...] = (e / jnp.sum(e, axis=-1, keepdims=True)).astype(o_ref.dtype)


def _gate_kernel(low_ref, feat_ref, o_ref):
    g = jax.nn.sigmoid(jnp.mean(low_ref[...].astype(jnp.float32), axis=-1,
                                keepdims=True))
    o_ref[...] = (g * feat_ref[...]).astype(o_ref.dtype)


def _add_kernel(a_ref, b_ref, o_ref):
    o_ref[...] = a_ref[...] + b_ref[...]


def _fma_kernel(a_ref, b_ref, c_ref, o_ref):
    o_ref[...] = a_ref[...] * b_ref[...] + c_ref[...]


def _bcast_mul_kernel(x_ref, s_ref, o_ref):
    o_ref[...] = (x_ref[...] * s_ref[...]).astype(o_ref.dtype)


def _pool_kernel(x_ref, o_ref):
    x = x_ref[...].astype(jnp.float32)
    pmax = jnp.max(x, axis=1)[None]
    psum = jnp.sum(x, axis=1)[None]

    @pl.when(pl.program_id(0) == 0)
    def _():
        o_ref[0:1] = pmax
        o_ref[1:2] = psum

    @pl.when(pl.program_id(0) > 0)
    def _():
        o_ref[0:1] = jnp.maximum(o_ref[0:1], pmax)
        o_ref[1:2] = o_ref[1:2] + psum


def _ew_call(kernel, *arrs):
    shp = arrs[0].shape
    C = shp[-1]
    M = int(math.prod(shp[:-1]))
    tm = _pick_tile(M)
    flats = [a.reshape(M, C) for a in arrs]
    out = pl.pallas_call(
        kernel, grid=(M // tm,),
        in_specs=[pl.BlockSpec((tm, C), lambda i: (i, 0)) for _ in flats],
        out_specs=pl.BlockSpec((tm, C), lambda i: (i, 0)),
        out_shape=jax.ShapeDtypeStruct((M, C), flats[0].dtype),
        compiler_params=_PAR,
    )(*flats)
    return out.reshape(shp)


def ew_add(a, b):
    return _ew_call(_add_kernel, a, b)


def ew_fma(a, b, c):
    return _ew_call(_fma_kernel, a, b, c)


def scale_rows(x, s):
    """x:(N,H,W,C) * s:(N,H,W,1), broadcast over channels inside the kernel."""
    N, H, W, C = x.shape
    M = N * H * W
    tm = _pick_tile(M)
    out = pl.pallas_call(
        _bcast_mul_kernel, grid=(M // tm,),
        in_specs=[pl.BlockSpec((tm, C), lambda i: (i, 0)),
                  pl.BlockSpec((tm, 1), lambda i: (i, 0))],
        out_specs=pl.BlockSpec((tm, C), lambda i: (i, 0)),
        out_shape=jax.ShapeDtypeStruct((M, C), x.dtype),
        compiler_params=_PAR,
    )(x.reshape(M, C), s.reshape(M, 1))
    return out.reshape(N, H, W, C)


def scale_channels(x, s):
    """x:(N,H,W,C) * s:(N,C), broadcast spatially inside the kernel."""
    N, H, W, C = x.shape
    HW = H * W
    thw = _pick_tile(HW)
    out = pl.pallas_call(
        _bcast_mul_kernel, grid=(N, HW // thw),
        in_specs=[pl.BlockSpec((1, thw, C), lambda b, t: (b, t, 0)),
                  pl.BlockSpec((1, 1, C), lambda b, t: (b, 0, 0))],
        out_specs=pl.BlockSpec((1, thw, C), lambda b, t: (b, t, 0)),
        out_shape=jax.ShapeDtypeStruct((N, HW, C), x.dtype),
        compiler_params=pltpu.CompilerParams(
            dimension_semantics=("parallel", "parallel")),
    )(x.reshape(N, HW, C), s.reshape(N, 1, C))
    return out.reshape(N, H, W, C)


def softmax_channels(x):
    N, H, W, C = x.shape
    M = N * H * W
    tm = _pick_tile(M)
    out = pl.pallas_call(
        _softmax_kernel, grid=(M // tm,),
        in_specs=[pl.BlockSpec((tm, C), lambda i: (i, 0))],
        out_specs=pl.BlockSpec((tm, C), lambda i: (i, 0)),
        out_shape=jax.ShapeDtypeStruct((M, C), x.dtype),
        compiler_params=_PAR,
    )(x.reshape(M, C))
    return out.reshape(N, H, W, C)


# ----------------------------------------------------------------------------
# Non-local attention core (batched over groups)
# ----------------------------------------------------------------------------
def _attn_kernel(q_ref, k_ref, v_ref, o_ref):
    q = q_ref[0].astype(jnp.float32)           # (L, Ck), already L2-normalized
    k = k_ref[0].astype(jnp.float32)
    sim = lax.dot_general(q, k, (((1,), (1,)), ((), ())),
                          preferred_element_type=jnp.float32) + 1.0
    o_ref[0] = jnp.dot(sim, v_ref[0].astype(jnp.float32),
                       preferred_element_type=jnp.float32).astype(o_ref.dtype)


def nl_attention_core(q, k, v):
    B, L, Ck = q.shape
    Cv = v.shape[2]
    return pl.pallas_call(
        _attn_kernel,
        grid=(B,),
        in_specs=[pl.BlockSpec((1, L, Ck), lambda b: (b, 0, 0)),
                  pl.BlockSpec((1, L, Ck), lambda b: (b, 0, 0)),
                  pl.BlockSpec((1, L, Cv), lambda b: (b, 0, 0))],
        out_specs=pl.BlockSpec((1, L, Cv), lambda b: (b, 0, 0)),
        out_shape=jax.ShapeDtypeStruct((B, L, Cv), ACT_DTYPE),
        compiler_params=_PAR,
    )(q, k, v)


# ----------------------------------------------------------------------------
# Conv / resize glue (im2col in JAX, matmul in Pallas)
# ----------------------------------------------------------------------------
def _im2col(x, kh, kw, stride, pad):
    # TODO(synk): replace with an in-kernel tap-accumulation (grid axis over the
    # kh*kw taps) to avoid materializing ~kh*kw x the activation bytes in HBM.
    N, H, W, C = x.shape
    xp = jnp.pad(x, ((0, 0), (pad, pad), (pad, pad), (0, 0)))
    Ho = (H + 2 * pad - kh) // stride + 1
    Wo = (W + 2 * pad - kw) // stride + 1
    cols = []
    for dy in range(kh):
        for dx in range(kw):
            cols.append(xp[:, dy:dy + stride * (Ho - 1) + 1:stride,
                           dx:dx + stride * (Wo - 1) + 1:stride, :])
    return jnp.concatenate(cols, axis=-1), Ho, Wo


def conv2d(x, p, *, stride=1, use_bn=False, act="none", l2norm=False,
           head=None, emit_main=True):
    w, b = p["w"], p["b"]
    kh, kw, cin, cout = w.shape
    N = x.shape[0]
    if kh == 1 and kw == 1 and stride == 1:
        Ho, Wo = x.shape[1], x.shape[2]
        cols = x.reshape(N * Ho * Wo, cin)
    else:
        pad = (kh - 1) // 2
        cols, Ho, Wo = _im2col(x, kh, kw, stride, pad)
        cols = cols.reshape(N * Ho * Wo, kh * kw * cin)
    res = dense(cols, w.reshape(kh * kw * cin, cout), b, use_bn=use_bn,
                act=act, l2norm=l2norm, head=head, emit_main=emit_main)
    rs = lambda a: a.reshape(N, Ho, Wo, a.shape[-1])
    if head is None:
        return rs(res)
    if emit_main:
        return rs(res[0]), rs(res[1])
    return rs(res)


def cbr(x, p, stride=1, head=None, emit_main=True):
    # conv_block / OCBlock stub: conv + BatchNorm(train) + ReLU
    return conv2d(x, p, stride=stride, use_bn=True, act="relu",
                  head=head, emit_main=emit_main)


def nearest_resize(x, oh, ow):   # torch 'nearest': src = floor(dst * in / out)
    N, H, W, C = x.shape
    hi = (jnp.arange(oh) * H) // oh
    wi = (jnp.arange(ow) * W) // ow
    return x[:, hi, :, :][:, :, wi, :]


def up2(x):
    _, H, W, _ = x.shape
    return nearest_resize(x, 2 * H, 2 * W)


# ----------------------------------------------------------------------------
# Submodules
# ----------------------------------------------------------------------------
def channel_attention_fwd(p1, p2, x):
    N, H, W, C = x.shape
    HW = H * W
    thw = _pick_tile(HW)
    stats = pl.pallas_call(
        _pool_kernel, grid=(HW // thw,),
        in_specs=[pl.BlockSpec((N, thw, C), lambda t: (0, t, 0))],
        out_specs=pl.BlockSpec((2, N, C), lambda t: (0, 0, 0)),
        out_shape=jax.ShapeDtypeStruct((2, N, C), jnp.float32),
        compiler_params=pltpu.CompilerParams(dimension_semantics=("arbitrary",)),
    )(x.reshape(N, HW, C))
    pooled = stats[0] + stats[1] / HW            # maxpool(1) + avgpool(1)
    h1 = dense(pooled, p1["w"].reshape(C, -1), p1["b"], act="relu")
    return dense(h1, p2["w"].reshape(-1, C), p2["b"], act="sigmoid")   # (N, C)


def cf_module_fwd(p_conv, feature, low_feature):
    N, H, W, C = feature.shape
    low = nearest_resize(low_feature, H, W)
    Cl = low.shape[-1]
    M = N * H * W
    tm = _pick_tile(M)
    gated = pl.pallas_call(
        _gate_kernel, grid=(M // tm,),
        in_specs=[pl.BlockSpec((tm, Cl), lambda i: (i, 0)),
                  pl.BlockSpec((tm, C), lambda i: (i, 0))],
        out_specs=pl.BlockSpec((tm, C), lambda i: (i, 0)),
        out_shape=jax.ShapeDtypeStruct((M, C), feature.dtype),
        compiler_params=_PAR,
    )(low.reshape(M, Cl), feature.reshape(M, C)).reshape(N, H, W, C)
    return cbr(jnp.concatenate([gated, low], axis=-1), p_conv)


# ---- non-local attention, NHWC throughout -----------------------------------
def _group_long(x, ph, pw):      # (n,h,w,C) -> (n*ph*pw, qh*qw, C)
    n, h, w, C = x.shape
    qh, qw = h // ph, w // pw
    x = x.reshape(n, qh, ph, qw, pw, C)
    return jnp.transpose(x, (0, 2, 4, 1, 3, 5)).reshape(n * ph * pw, qh * qw, C)


def _ungroup_long(x, n, h, w, ph, pw):
    qh, qw = h // ph, w // pw
    C = x.shape[-1]
    x = x.reshape(n, ph, pw, qh, qw, C)
    return jnp.transpose(x, (0, 3, 1, 4, 2, 5)).reshape(n, h, w, C)


def _group_short(x, ph, pw):     # (n,h,w,C) -> (n*qh*qw, ph*pw, C)
    n, h, w, C = x.shape
    qh, qw = h // ph, w // pw
    x = x.reshape(n, qh, ph, qw, pw, C)
    return jnp.transpose(x, (0, 1, 3, 2, 4, 5)).reshape(n * qh * qw, ph * pw, C)


def _ungroup_short(x, n, h, w, ph, pw):
    qh, qw = h // ph, w // pw
    C = x.shape[-1]
    x = x.reshape(n, qh, qw, ph, pw, C)
    return jnp.transpose(x, (0, 1, 3, 2, 4, 5)).reshape(n, h, w, C)


def non_local_fwd(p, q_map, k_map, v_map, grouping, ph, pw):
    """non_local_attention in NHWC.  The 1x1 projections (and their per-call
    training-mode BN + per-row L2 norm) are position independent, so they are
    applied once on the full feature maps (identical batch statistics to the
    regrouped PyTorch layout); only the attention core runs per group."""
    n, h, w, C = q_map.shape
    Ck = p["f_key"]["w"].shape[-1]
    Cv = p["f_value"]["w"].shape[-1]
    M = n * h * w
    qp = dense(q_map.reshape(M, C), p["f_key"]["w"].reshape(C, Ck),
               p["f_key"]["b"], use_bn=True, l2norm=True)        # f_query = f_key
    kp = dense(k_map.reshape(M, C), p["f_key"]["w"].reshape(C, Ck),
               p["f_key"]["b"], use_bn=True, l2norm=True)
    vp = dense(v_map.reshape(M, C), p["f_value"]["w"].reshape(C, Cv),
               p["f_value"]["b"])
    group = _group_long if grouping == "long" else _group_short
    ungroup = _ungroup_long if grouping == "long" else _ungroup_short
    ctx = nl_attention_core(group(qp.reshape(n, h, w, Ck), ph, pw),
                            group(kp.reshape(n, h, w, Ck), ph, pw),
                            group(vp.reshape(n, h, w, Cv), ph, pw))
    ctx = ungroup(ctx, n, h, w, ph, pw)
    out = dense(ctx.reshape(M, Cv), p["w"]["w"].reshape(Cv, C), p["w"]["b"])
    return out.reshape(n, h, w, C)


def efficient_nl_fwd(p_long, p_short, q_map, k_map, v_map, ph=4, pw=4):
    x = non_local_fwd(p_long, q_map, k_map, v_map, "long", ph, pw)
    return non_local_fwd(p_short, x, k_map, v_map, "short", ph, pw)


# ----------------------------------------------------------------------------
# Parameters (deterministic, xavier-uniform weights, zero biases)
# ----------------------------------------------------------------------------
class _KeyGen:
    def __init__(self, key):
        self._key = key

    def __call__(self):
        self._key, sub = jax.random.split(self._key)
        return sub


def conv_p(kg, kh, kw, cin, cout, zero=False):
    if zero:
        w = jnp.zeros((kh, kw, cin, cout), jnp.float32)
    else:
        fan_in, fan_out = cin * kh * kw, cout * kh * kw
        bound = math.sqrt(6.0 / (fan_in + fan_out))
        w = jax.random.uniform(kg(), (kh, kw, cin, cout), jnp.float32, -bound, bound)
    return {"w": w, "b": jnp.zeros((cout,), jnp.float32)}


def init_nonlocal(kg, c):
    ck = c // 2
    return {"f_key": conv_p(kg, 1, 1, c, ck),
            "f_value": conv_p(kg, 1, 1, c, ck),
            "w": conv_p(kg, 1, 1, ck, c, zero=True)}   # torch zero-inits w


def init_stage1(kg, channels):
    c0, c1, c2 = channels
    P = {}
    # TODO(synk): backbone.build_model is undefined — deterministic conv-stack stub.
    P["bb0"] = conv_p(kg, 3, 3, 3, 8)
    P["bb1"] = conv_p(kg, 3, 3, 8, 8)
    P["bb2"] = conv_p(kg, 3, 3, 8, c0)
    P["bb3"] = conv_p(kg, 3, 3, c0, c1)
    P["bb4"] = conv_p(kg, 3, 3, c1, c2)
    P["conv1"] = conv_p(kg, 3, 3, c2, c1)
    P["ca1"] = conv_p(kg, 1, 1, c2, c2 // 4)
    P["ca2"] = conv_p(kg, 1, 1, c2 // 4, c2)
    P["s1"] = conv_p(kg, 3, 3, c0 + c1, c0)
    P["s2"] = conv_p(kg, 3, 3, c1, c1)
    P["decode1"] = conv_p(kg, 3, 3, c1, c1)
    P["decode2"] = conv_p(kg, 3, 3, c1 + c1, c0)
    P["decode3"] = conv_p(kg, 3, 3, c0 + c0, 16)
    P["mid_conv"] = conv_p(kg, 1, 1, 16, 3)
    P["side1"] = conv_p(kg, 1, 1, c1, 3)
    P["side2"] = conv_p(kg, 1, 1, c0, 3)
    return P


def init_stage2(kg, channels):
    c0, c1, c2 = channels
    P = {}
    # TODO(synk): backbone.build_model encoder is undefined — conv-stack stub.
    P["enc0"] = conv_p(kg, 3, 3, 6, 10)
    P["enc1"] = conv_p(kg, 3, 3, 10, 10)
    P["enc2"] = conv_p(kg, 3, 3, 10, c0)
    P["enc3"] = conv_p(kg, 3, 3, c0, c1)
    P["enc4a"] = conv_p(kg, 3, 3, c1, c1)
    P["enc4b"] = conv_p(kg, 3, 3, c1, c2)
    P["decode1"] = conv_p(kg, 3, 3, c2, c1)
    P["decode2"] = conv_p(kg, 3, 3, c1 + c1, c1)
    P["decode3"] = conv_p(kg, 3, 3, c1 + c0, 10)
    P["decode4"] = conv_p(kg, 3, 3, 10 + 10, 10)
    P["c"] = conv_p(kg, 1, 1, 10, 10)
    P["final_conv"] = conv_p(kg, 3, 3, 10, 1)
    P["img_conv1"] = conv_p(kg, 3, 3, 3, 20)     # merged image_conv1 ([10,10] -> 20)
    P["img_conv2"] = conv_p(kg, 3, 3, 20, c1)
    P["enc_long"] = init_nonlocal(kg, c1)
    P["enc_short"] = init_nonlocal(kg, c1)
    P["dec_long"] = init_nonlocal(kg, c1)
    P["dec_short"] = init_nonlocal(kg, c1)
    return P


# ----------------------------------------------------------------------------
# Stage forwards
# ----------------------------------------------------------------------------
def stage1_forward(p, image, image_size):
    # TODO(synk): backbone stub (x1 @ H/2, x2 @ H/2, x3 @ H/4, x4 @ H/8).
    x0 = cbr(image, p["bb0"])
    x1 = cbr(x0, p["bb1"], stride=2)
    x2 = cbr(x1, p["bb2"])
    x3 = cbr(x2, p["bb3"], stride=2)
    x4 = cbr(x3, p["bb4"], stride=2)

    ca = channel_attention_fwd(p["ca1"], p["ca2"], x4)        # (N, C)
    x4 = scale_channels(x4, ca)
    x4 = cbr(x4, p["conv1"])
    x2 = cf_module_fwd(p["s1"], x2, x4)
    x3 = cbr(x3, p["s2"])

    # side1/side2/mid_conv are fused 1x1 epilogue heads of their decode blocks
    # (1x1 conv commutes with the nearest upsample, and nearest-resize composes).
    d1, h1 = cbr(x4, p["decode1"], head=p["side1"])
    x4 = up2(d1)
    d2, h2 = cbr(jnp.concatenate([x3, x4], axis=-1), p["decode2"], head=p["side2"])
    x3 = up2(d2)
    h3 = cbr(jnp.concatenate([x2, x3], axis=-1), p["decode3"],
             head=p["mid_conv"], emit_main=False)
    x2 = up2(h3)
    s1 = nearest_resize(h1, image_size, image_size)
    s2 = nearest_resize(h2, image_size, image_size)
    return [x2, s1, s2]


def stage2_forward(p, image, stage1_output, channels):
    c0, c1, c2 = channels
    N, H, W, _ = image.shape
    seg_softmax = softmax_channels(stage1_output)
    pred_fg = seg_softmax[..., 1:2]
    pred_unknown = seg_softmax[..., 2:3]

    # image feature path: merged image_conv1 (3->20) -> image_conv2 (->c1, /2) -> down4
    f1 = cbr(image, p["img_conv1"])
    imf = cbr(f1, p["img_conv2"], stride=2)
    image_feature = nearest_resize(imf, H // 8, W // 8)
    key_feature = image_feature
    value_feature = image_feature

    # TODO(synk): encoder stub with non_local1 fused at the H/8 level.
    enc_in = jnp.concatenate([image, seg_softmax], axis=-1)
    x0 = cbr(enc_in, p["enc0"])
    x1 = cbr(x0, p["enc1"])
    x2 = cbr(x1, p["enc2"], stride=2)
    x3 = cbr(x2, p["enc3"], stride=2)
    f4 = cbr(x3, p["enc4a"], stride=2)
    unk8 = nearest_resize(pred_unknown, H // 8, W // 8)
    gated = scale_rows(f4, unk8)
    att = efficient_nl_fwd(p["enc_long"], p["enc_short"], gated,
                           key_feature, value_feature)
    f4 = ew_add(f4, att)
    x4 = cbr(f4, p["enc4b"])

    # decoder
    x4 = up2(cbr(x4, p["decode1"]))
    x3 = cbr(jnp.concatenate([x3, x4], axis=-1), p["decode2"])
    qd = scale_rows(nearest_resize(x3, H // 8, W // 8), unk8)
    decode_nl = up2(efficient_nl_fwd(p["dec_long"], p["dec_short"],
                                     qd, key_feature, value_feature))
    x3 = up2(ew_add(x3, decode_nl))
    x2 = up2(cbr(jnp.concatenate([x2, x3], axis=-1), p["decode3"]))
    x1 = cbr(jnp.concatenate([x1, x2], axis=-1), p["decode4"])
    pred = conv2d(cbr(x1, p["c"]), p["final_conv"])
    final_pred = ew_fma(pred, pred_unknown, pred_fg)
    return [final_pred, pred]


def matting_end_to_end_fwd(params, image, image_size, channels):
    stage1_output = stage1_forward(params["stage1"], image, image_size)
    stage2_output = stage2_forward(params["stage2"], image, stage1_output[0], channels)
    return stage1_output, stage2_output


# ----------------------------------------------------------------------------
# Main
# ----------------------------------------------------------------------------
if __name__ == "__main__":
    N, H, W = 1, 32, 32          # small but satisfies /8 and ph=pw=4 constraints
    channels = (8, 16, 32)       # stub for layer_config[-2]
    image_size = 32              # args.image_size

    root = jax.random.PRNGKey(0)
    pkey, ikey = jax.random.split(root)
    kg = _KeyGen(pkey)
    params = {"stage1": init_stage1(kg, channels),
              "stage2": init_stage2(kg, channels)}

    image = jax.random.normal(ikey, (N, H, W, 3), jnp.float32)  # NHWC layout

    stage1_out, stage2_out = matting_end_to_end_fwd(params, image, image_size, channels)
    for leaf in jax.tree_util.tree_leaves((stage1_out, stage2_out)):
        jax.block_until_ready(leaf)

    print("KERNEL_OK")
</pallas_src>

<mosaic_0001>
module attributes {stable_mosaic.version = 11 : i64} {
  func.func @_mm_stats_kernel(%arg0: i32, %arg1: memref<512x27xf32, #tpu.memory_space<vmem>>, %arg2: memref<27x8xf32, #tpu.memory_space<vmem>>, %arg3: memref<512x8xf32, #tpu.memory_space<vmem>>, %arg4: memref<1x2x8xf32, #tpu.memory_space<vmem>>) attributes {dimension_semantics = [#tpu.dimension_semantics<parallel>], iteration_bounds = array<i64: 2>, scalar_prefetch = 0 : i64, scratch_operands = 0 : i64, tpu.core_type = #tpu.core_type<tc>, window_params = [{transform_indices = @transform_0, window_bounds = array<i64: 512, 27>}, {pipeline_mode = #tpu.pipeline_mode<synchronous>, transform_indices = @transform_1, window_bounds = array<i64: 27, 8>}, {transform_indices = @transform_2, window_bounds = array<i64: 512, 8>}, {transform_indices = @transform_3, window_bounds = array<i64: 1, 2, 8>}]} {
    %c0 = arith.constant 0 : index
    %c0_0 = arith.constant 0 : index
    %0 = vector.load %arg1[%c0, %c0_0] : memref<512x27xf32, #tpu.memory_space<vmem>>, vector<512x27xf32>
    %c0_1 = arith.constant 0 : index
    %c0_2 = arith.constant 0 : index
    %1 = vector.load %arg2[%c0_1, %c0_2] : memref<27x8xf32, #tpu.memory_space<vmem>>, vector<27x8xf32>
    %cst = arith.constant dense<0.000000e+00> : vector<512x8xf32>
    %2 = tpu.matmul %0, %1, %cst {dimension_numbers = #tpu.dot_dimension_numbers<[1], [0], [0], [1], [0, 0, 1, 1], [], []>} : vector<512x27xf32>, vector<27x8xf32>, vector<512x8xf32> -> vector<512x8xf32>
    %c0_3 = arith.constant 0 : index
    %c0_4 = arith.constant 0 : index
    %3 = vector.load %arg3[%c0_3, %c0_4] : memref<512x8xf32, #tpu.memory_space<vmem>>, vector<512x8xf32>
    tpu.vector_store %arg3[%c0_3, %c0_4], %2 {strides = array<i32>} : memref<512x8xf32, #tpu.memory_space<vmem>>, vector<512x8xf32>,
    %cst_5 = arith.constant dense<0.000000e+00> : vector<8xf32>
    %4 = vector.multi_reduction <add>, %2, %cst_5 [0] : vector<512x8xf32> to vector<8xf32>
    %5 = vector.shape_cast %4 : vector<8xf32> to vector<1x8xf32>
    %6 = vector.shape_cast %5 : vector<1x8xf32> to vector<1x1x8xf32>
    %c0_6 = arith.constant 0 : index
    %c0_7 = arith.constant 0 : index
    %c0_8 = arith.constant 0 : index
    %7 = vector.load %arg4[%c0_6, %c0_7, %c0_8] : memref<1x2x8xf32, #tpu.memory_space<vmem>>, vector<1x1x8xf32>
    tpu.vector_store %arg4[%c0_6, %c0_7, %c0_8], %6 {strides = array<i32>} : memref<1x2x8xf32, #tpu.memory_space<vmem>>, vector<1x1x8xf32>,
    %8 = arith.mulf %2, %2 : vector<512x8xf32>
    %cst_9 = arith.constant dense<0.000000e+00> : vector<8xf32>
    %9 = vector.multi_reduction <add>, %8, %cst_9 [0] : vector<512x8xf32> to vector<8xf32>
    %10 = vector.shape_cast %9 : vector<8xf32> to vector<1x8xf32>
    %11 = vector.shape_cast %10 : vector<1x8xf32> to vector<1x1x8xf32>
    %c0_10 = arith.constant 0 : index
    %c1 = arith.constant 1 : index
    %c0_11 = arith.constant 0 : index
    %12 = vector.load %arg4[%c0_10, %c1, %c0_11] : memref<1x2x8xf32, #tpu.memory_space<vmem>>, vector<1x1x8xf32>
    tpu.vector_store %arg4[%c0_10, %c1, %c0_11], %11 {strides = array<i32>} : memref<1x2x8xf32, #tpu.memory_space<vmem>>, vector<1x1x8xf32>,
    return
  }
  func.func @transform_0(%arg0: i32) -> (i32, i32) {
    %c0_i32 = arith.constant 0 : i32
    %c0_i32_0 = arith.constant 0 : i32
    return %arg0, %c0_i32 : i32, i32
  }
  func.func @transform_1(%arg0: i32) -> (i32, i32) {
    %c0_i32 = arith.constant 0 : i32
    %c0_i32_0 = arith.constant 0 : i32
    %c0_i32_1 = arith.constant 0 : i32
    return %c0_i32, %c0_i32_0 : i32, i32
  }
  func.func @transform_2(%arg0: i32) -> (i32, i32) {
    %c0_i32 = arith.constant 0 : i32
    %c0_i32_0 = arith.constant 0 : i32
    return %arg0, %c0_i32 : i32, i32
  }
  func.func @transform_3(%arg0: i32) -> (i32, i32, i32) {
    %c0_i32 = arith.constant 0 : i32
    %c0_i32_0 = arith.constant 0 : i32
    %c0_i32_1 = arith.constant 0 : i32
    return %arg0, %c0_i32, %c0_i32_0 : i32, i32, i32
  }
}

</mosaic_0001>

<bundles_post_ra>
// kernel: tpu_custom_call.1
= control target key start
LH: loop header
LB: loop body
LE: loop exit
PB: predicated region body
PF: predicated region fallthrough
CT: control target
= control target key end

     0   :  { %9 = vsyncpa [#allocation3], 0  ;;  %s2443_s0 = inlined_call_operand.vmem [shape: f32[1024,27], index: 0, kind: input, shape index: {}]   ;;  %s2444_s1 = inlined_call_operand.vmem [shape: f32[27,8], index: 1, kind: input, shape index: {}]   ;;  %s2445_s2 = inlined_call_operand.vmem [shape: f32[1024,8], index: 2, kind: output, shape index: {0}]   ;;  %s2446_s3 = inlined_call_operand.hbm [shape: f32[2,2,8], index: 3, kind: output, shape index: {1}]  }
   0x1   :  { %11 = vsyncpa [#allocation3 + $0x1], 0  ;;  %s1730_s12 = smov 0   ;;  %s1732_s13 = smov 0  }
   0x2   :  { %s1734_s14 = smov 0   ;;  %s1736_s15 = smov 0  }
   0x3 LB: > { %s1751_s16 = sadd.s32 4294967295, %s1706_s15   ;;  %s1340_s17 = sadd.s32 4294967294, %s1706_s15   ;;  %s1706_s15 = sphi %s1736_s15, %s2454_s15   ;;  %s1702_s14 = sphi %s1734_s14, %s2453_s14   ;;  %s1698_s13 = sphi %s1732_s13, %s2452_s13   ;;  %s1694_s12 = sphi %s1730_s12, %s2451_s12  }
   0x4   : > { %s1755_s18 = sadd.s32 1, %s1706_s15   ;;  %s97_s19 = sadd.s32 1, %s1702_s14 }
   0x5   : > { %s94_s20 = ssub.s32 %s1706_s15, %s1755_s18  ;;  %p107_p0 = scmp.ne.s32.totalorder %s1702_s14, %s1698_s13 }
   0x6   : > { %p95_p1 = scmp.eq.s32.totalorder %s94_s20, 0  ;;  %p108_p2 = scmp.eq.s32.totalorder %s1751_s16, 1 }
   0x7   : > { %p113_p3 = scmp.ne.s32.totalorder %s1698_s13, %s1694_s12  ;;  %p114_p4 = scmp.eq.s32.totalorder %s1340_s17, 1 }
   0x8   : > { %s1766_s21 = scalar_select %p95_p1, %s1702_s14, %s97_s19  }
   0x9   : > { %p1768_p5 = por %p108_p2, %p107_p0  ;;  %p1772_p6 = por %p114_p4, %p113_p3 }
   0xa   : > { %p1343_p7 = scmp.ge.s32.totalorder %s1706_s15, 1  ;;  %p144_p8 = scmp.lt.s32.totalorder %s1706_s15, 3 }
   0xc   : > { %p145_p9 = pnand %p1343_p7, %p144_p8 }
   0xd   : > { %v249_v0 = vld [vmem:[%s2444_s1] sm:$0xff] (!%p145_p9)  ;;  %v250_v1 = vld [vmem:[%s2444_s1 + $0x8] sm:$0xff] (!%p145_p9)  ;;  %v251_v2 = vld [vmem:[%s2444_s1 + $0x10] sm:$0xff] (!%p145_p9)  ;;  %vm446_vm0 = vcmask (!%p145_p9), 1042432   ;;  %s1345_s30 = sshll.u32 (!%p145_p9), %s1751_s16, 6  ;;  %vm1708_vm1 = vmmov (!%p145_p9), 1  }
   0xe   : > { %148 = sbr.rel (%p145_p9) target bundleno = 396 (0x18c), region = 28  ;;  %v1590_v3 = vpack.c.bf16 (!%p145_p9), %v250_v1, %v249_v0  ;;  %v252_v4 = vld [vmem:[%s2444_s1 + $0x18] sm:$0x7] (!%p145_p9)  ;;  %p174_p10 = scmp.lt.s32.totalorder (!%p145_p9), %s1345_s30, 127  ;;  %vm1791_vm2 = vmpackc.low (!%p145_p9), %vm446_vm0, %vm1708_vm1  ;;  %vm253_vm3 = vcmask (!%p145_p9), 220160   ;;  %vm835_vm4 = vcmask (!%p145_p9), 64512  }
   0xf   : > { %v1594_v5 = vpack.c.bf16 (!%p145_p9), %v252_v4, %v251_v2  ;;  %s170_s19 = sand.u32 (!%p145_p9), 1, %s1698_s13   ;;  %vm1033_vm5 = vcmask (!%p145_p9), 57344   ;;  %s1415_s24 = sshll.u32 (!%p145_p9), %s1751_s16, 5 }
  0x10   : > { %1591 = vmatprep.subr.bf16.mxu0 (!%p145_p9), %v1590_v3  ;;  %1600 = vmatprep.subr.bf16.mxu1 (!%p145_p9), %v1590_v3  ;;  %s1344_s20 = sshll.u32 (!%p145_p9), %s170_s19, 1  ;;  %s2401_s29 = scalar_lea.hbm (!%p145_p9), %s2446_s3, %s1415_s24 }
  0x11   : > { %1593 = vmatpush3.bf16.msra.mxu0 (!%p145_p9), %v1590_v3  ;;  %1602 = vmatpush3.bf16.msra.mxu1 (!%p145_p9), %v1590_v3  ;;  %s172_s25 = scalar_lea.vmem (!%p145_p9), [#allocation2], %s1344_s20  ;;  %s1709_s16 = smov (!%p145_p9), [#allocation2]  }
  0x12   : > { %1596 = vmatprep.subr.msk.bf16.mxu0 (!%p145_p9), %vm1791_vm2, %v1594_v5  ;;  %1601 = vmatprep.subr.msk.bf16.mxu1 (!%p145_p9), %vm1791_vm2, %v1594_v5  ;;  %s1256_s26 = sshll.u32 (!%p145_p9), %s172_s25, 4  ;;  %s1648_s5 = sshll.u32 (!%p145_p9), %s1709_s16, 4  ;;  %s2403_s26 = int_to_ptr.vmem [resolvable:$true] %s1256_s26  ;;  %s1649_s5 = int_to_ptr.vmem [resolvable:$false] %s1648_s5 }
  0x13   : > { %s1644_s4 = scalar_lea.vmem (!%p145_p9), %s2403_s26, 32  ;;  %p1651_p0 = scmp.lt.s32.totalorder (!%p145_p9), %s2403_s26, %s1649_s5 }
  0x14   : > { %p1645_p11 = scmp.ne.s32.totalorder (!%p145_p9), %s2403_s26, %s1644_s4 }
  0x15   : > { %s2456_s30 = smov (!%p174_p10, %s1345_s30), 127  ;;  %1599 = vmatpush3.bf16.msk.msra.mxu0 %vm1791_vm2, %v1594_v5  ;;  %1603 = vmatpush3.bf16.msk.msra.mxu1 %vm1791_vm2, %v1594_v5 }
  0x16   : > { %s1346_s6 = sshll.u32 %s2456_s30, 3  ;;  %s1239_s30 = scalar_lea.sflag [#allocation3], %s170_s19 }
  0x17   : > { %s1807_s9 = scalar_lea.vmem %s2443_s0, %s1346_s6  ;;  %s1946_s17 = scalar_lea.vmem %s2445_s2, %s1346_s6 }
  0x18   : > { %v185_v7 = vld [vmem:[%s1807_s9] sm:$0xff]  ;;  %v186_v8 = vld [vmem:[%s1807_s9 + $0x8] sm:$0xff]  ;;  %v187_v9 = vld [vmem:[%s1807_s9 + $0x10] sm:$0xff]  ;;  %p1646_p12 = pnand %p1645_p11, %p1768_p5  ;;  %s1650_s6 = scalar_lea.vmem %s1649_s5, 64 }
  0x19   : > { %1494 = vmatprep.mubr.msk.f32.mxu0 %vm253_vm3, %v185_v7  ;;  %v188_v10 = vld [vmem:[%s1807_s9 + $0x18] sm:$0xff]  ;;  %v189_v11 = vld [vmem:[%s1807_s9 + $0x20] sm:$0xff]  ;;  %v190_v12 = vld [vmem:[%s1807_s9 + $0x28] sm:$0xff]  ;;  %p1652_p1 = scmp.lt.s32.totalorder %s1650_s6, %s1644_s4 }
  0x1a   : > { %1495 = vmatmul.mubr.msk.f32.vlgmr.msra.gmra.mrb[0].mxu0 %vm253_vm3, %v186_v8  ;;  %v191_v13 = vld [vmem:[%s1807_s9 + $0x30] sm:$0xff]  ;;  %v217_v14 = vld [vmem:[%s1807_s9 + $0x100] sm:$0xff]  ;;  %v218_v15 = vld [vmem:[%s1807_s9 + $0x108] sm:$0xff]  ;;  %p1647_p13 = pneg %p1646_p12 }
  0x1b   : > { %1497 = vmatprep.mubr.msk.f32.mxu0 %vm253_vm3, %v187_v9  ;;  %1542 = vmatprep.mubr.msk.f32.mxu1 %vm253_vm3, %v217_v14  ;;  %v219_v16 = vld [vmem:[%s1807_s9 + $0x110] sm:$0xff]  ;;  %v192_v17 = vld [vmem:[%s1807_s9 + $0x38] sm:$0xff]  ;;  %v193_v19 = vld [vmem:[%s1807_s9 + $0x40] sm:$0xff]  ;;  %p1653_p2 = por %p1652_p1, %p1651_p0 }
  0x1c   : > { %1543 = vmatmul.mubr.msk.f32.vlgmr.msra.gmra.mrb[0].mxu1 %vm253_vm3, %v218_v15  ;;  %v220_v18 = vld [vmem:[%s1807_s9 + $0x118] sm:$0xff]  ;;  %v221_v20 = vld [vmem:[%s1807_s9 + $0x120] sm:$0xff]  ;;  %v194_v21 = vld [vmem:[%s1807_s9 + $0x48] sm:$0xff] }
  0x1d   : > { %1545 = vmatprep.mubr.msk.f32.mxu1 %vm253_vm3, %v219_v16  ;;  %v222_v22 = vld [vmem:[%s1807_s9 + $0x128] sm:$0xff]  ;;  %v195_v23 = vld [vmem:[%s1807_s9 + $0x50] sm:$0xff]  ;;  %v196_v25 = vld [vmem:[%s1807_s9 + $0x58] sm:$0xff]  ;;  %p1654_p3 = pnand %p1653_p2, %p1647_p13 }
  0x1e   : > { %1498 = vmatmul.mubr.msk.f32.gmra.mrb[2].mxu0 %vm253_vm3, %v188_v10  ;;  %v223_v24 = vld [vmem:[%s1807_s9 + $0x130] sm:$0xff]  ;;  %v224_v26 = vld [vmem:[%s1807_s9 + $0x138] sm:$0xff]  ;;  %v197_v27 = vld [vmem:[%s1807_s9 + $0x60] sm:$0xff] }
  0x1f   : > { %1500 = vmatprep.mubr.msk.f32.mxu0 %vm253_vm3, %v189_v11  ;;  %v225_v28 = vld [vmem:[%s1807_s9 + $0x140] sm:$0xff]  ;;  %v198_v29 = vld [vmem:[%s1807_s9 + $0x68] sm:$0xff]  ;;  %v199_v31 = vld [vmem:[%s1807_s9 + $0x70] sm:$0xff] }
  0x20   : > { %1546 = vmatmul.mubr.msk.f32.gmra.mrb[2].mxu1 %vm253_vm3, %v220_v18  ;;  %v226_v30 = vld [vmem:[%s1807_s9 + $0x148] sm:$0xff]  ;;  %v227_v32 = vld [vmem:[%s1807_s9 + $0x150] sm:$0xff]  ;;  %v200_v33 = vld [vmem:[%s1807_s9 + $0x78] sm:$0xff] }
  0x21   : > { %1548 = vmatprep.mubr.msk.f32.mxu1 %vm253_vm3, %v221_v20  ;;  %v228_v34 = vld [vmem:[%s1807_s9 + $0x158] sm:$0xff]  ;;  %v201_v35 = vld [vmem:[%s1807_s9 + $0x80] sm:$0xff]  ;;  %v202_v37 = vld [vmem:[%s1807_s9 + $0x88] sm:$0xff] }
  0x22   : > { %1501 = vmatmul.mubr.msk.f32.gmra.mrb[4].mxu0 %vm253_vm3, %v190_v12  ;;  %v229_v36 = vld [vmem:[%s1807_s9 + $0x160] sm:$0xff]  ;;  %v230_v38 = vld [vmem:[%s1807_s9 + $0x168] sm:$0xff]  ;;  %v203_v39 = vld [vmem:[%s1807_s9 + $0x90] sm:$0xff] }
  0x23   : > { %1503 = vmatprep.mubr.msk.f32.mxu0 %vm253_vm3, %v191_v13  ;;  %v231_v40 = vld [vmem:[%s1807_s9 + $0x170] sm:$0xff]  ;;  %v204_v41 = vld [vmem:[%s1807_s9 + $0x98] sm:$0xff]  ;;  %v205_v43 = vld [vmem:[%s1807_s9 + $0xa0] sm:$0xff] }
  0x24   : > { %1549 = vmatmul.mubr.msk.f32.gmra.mrb[4].mxu1 %vm253_vm3, %v222_v22  ;;  %v232_v42 = vld [vmem:[%s1807_s9 + $0x178] sm:$0xff]  ;;  %v233_v44 = vld [vmem:[%s1807_s9 + $0x180] sm:$0xff]  ;;  %v206_v45 = vld [vmem:[%s1807_s9 + $0xa8] sm:$0xff] }
  0x25   : > { %1551 = vmatprep.mubr.msk.f32.mxu1 %vm253_vm3, %v223_v24  ;;  %v234_v46 = vld [vmem:[%s1807_s9 + $0x188] sm:$0xff]  ;;  %v207_v47 = vld [vmem:[%s1807_s9 + $0xb0] sm:$0xff]  ;;  %v208_v49 = vld [vmem:[%s1807_s9 + $0xb8] sm:$0xff] }
  0x26   : > { %1504 = vmatmul.mubr.msk.f32.gmra.mrb[6].mxu0 %vm253_vm3, %v192_v17  ;;  %v235_v48 = vld [vmem:[%s1807_s9 + $0x190] sm:$0xff]  ;;  %v236_v50 = vld [vmem:[%s1807_s9 + $0x198] sm:$0xff]  ;;  %v209_v51 = vld [vmem:[%s1807_s9 + $0xc0] sm:$0xff] }
  0x27   : > { %1506 = vmatprep.mubr.msk.f32.mxu0 %vm253_vm3, %v193_v19  ;;  %v237_v52 = vld [vmem:[%s1807_s9 + $0x1a0] sm:$0xff]  ;;  %v210_v53 = vld [vmem:[%s1807_s9 + $0xc8] sm:$0xff]  ;;  %v211_v55 = vld [vmem:[%s1807_s9 + $0xd0] sm:$0xff] }
  0x28   : > { %1552 = vmatmul.mubr.msk.f32.gmra.mrb[6].mxu1 %vm253_vm3, %v224_v26  ;;  %v238_v54 = vld [vmem:[%s1807_s9 + $0x1a8] sm:$0xff]  ;;  %v239_v56 = vld [vmem:[%s1807_s9 + $0x1b0] sm:$0xff]  ;;  %v212_v57 = vld [vmem:[%s1807_s9 + $0xd8] sm:$0xff] }
  0x29   : > { %1554 = vmatprep.mubr.msk.f32.mxu1 %vm253_vm3, %v225_v28  ;;  %v240_v58 = vld [vmem:[%s1807_s9 + $0x1b8] sm:$0xff]  ;;  %v213_v59 = vld [vmem:[%s1807_s9 + $0xe0] sm:$0xff]  ;;  %v214_v61 = vld [vmem:[%s1807_s9 + $0xe8] sm:$0xff] }
  0x2a   : > { %1507 = vmatmul.mubr.msk.f32.gmra.mrb[8].mxu0 %vm253_vm3, %v194_v21  ;;  %v241_v60 = vld [vmem:[%s1807_s9 + $0x1c0] sm:$0xff]  ;;  %v242_v62 = vld [vmem:[%s1807_s9 + $0x1c8] sm:$0xff]  ;;  %v215_v63 = vld [vmem:[%s1807_s9 + $0xf0] sm:$0xff] }
  0x2b   : > { %1509 = vmatprep.mubr.msk.f32.mxu0 %vm253_vm3, %v195_v23  ;;  %v243_v0 = vld [vmem:[%s1807_s9 + $0x1d0] sm:$0xff]  ;;  %v216_v1 = vld [vmem:[%s1807_s9 + $0xf8] sm:$0xff]  ;;  %v245_v3 = vld [vmem:[%s1807_s9 + $0x1e0] sm:$0xff] }
  0x2c   : > { %1555 = vmatmul.mubr.msk.f32.gmra.mrb[8].mxu1 %vm253_vm3, %v226_v30  ;;  %v244_v2 = vld [vmem:[%s1807_s9 + $0x1d8] sm:$0xff]  ;;  %v246_v4 = vld [vmem:[%s1807_s9 + $0x1e8] sm:$0xff]  ;;  %v247_v5 = vld [vmem:[%s1807_s9 + $0x1f0] sm:$0xff] }
  0x2d   : > { %1557 = vmatprep.mubr.msk.f32.mxu1 %vm253_vm3, %v227_v32  ;;  %v248_v6 = vld [vmem:[%s1807_s9 + $0x1f8] sm:$0xff] }
  0x2e   : > { %1510 = vmatmul.mubr.msk.f32.gmra.mrb[10].mxu0 %vm253_vm3, %v196_v25 }
  0x2f   : > { %1512 = vmatprep.mubr.msk.f32.mxu0 %vm253_vm3, %v197_v27 }
  0x30   : > { %1558 = vmatmul.mubr.msk.f32.gmra.mrb[10].mxu1 %vm253_vm3, %v228_v34 }
  0x31   : > { %1560 = vmatprep.mubr.msk.f32.mxu1 %vm253_vm3, %v229_v36 }
  0x32   : > { %1513 = vmatmul.mubr.msk.f32.gmra.mrb[12].mxu0 %vm253_vm3, %v198_v29 }
  0x33   : > { %1515 = vmatprep.mubr.msk.f32.mxu0 %vm253_vm3, %v199_v31 }
  0x34   : > { %1561 = vmatmul.mubr.msk.f32.gmra.mrb[12].mxu1 %vm253_vm3, %v230_v38 }
  0x35   : > { %1563 = vmatprep.mubr.msk.f32.mxu1 %vm253_vm3, %v231_v40 }
  0x36   : > { %1516 = vmatmul.mubr.msk.f32.gmra.mrb[14].mxu0 %vm253_vm3, %v200_v33 }
  0x37   : > { %1518 = vmatprep.mubr.msk.f32.mxu0 %vm253_vm3, %v201_v35 }
  0x38   : > { %1564 = vmatmul.mubr.msk.f32.gmra.mrb[14].mxu1 %vm253_vm3, %v232_v42 }
  0x39   : > { %1566 = vmatprep.mubr.msk.f32.mxu1 %vm253_vm3, %v233_v44 }
  0x3a   : > { %1519 = vmatmul.mubr.msk.f32.gmra.mrb[16].mxu0 %vm253_vm3, %v202_v37 }
  0x3b   : > { %1521 = vmatprep.mubr.msk.f32.mxu0 %vm253_vm3, %v203_v39 }
  0x3c   : > { %1567 = vmatmul.mubr.msk.f32.gmra.mrb[16].mxu1 %vm253_vm3, %v234_v46 }
  0x3d   : > { %1569 = vmatprep.mubr.msk.f32.mxu1 %vm253_vm3, %v235_v48 }
  0x3e   : > { %1522 = vmatmul.mubr.msk.f32.gmra.mrb[18].mxu0 %vm253_vm3, %v204_v41 }
  0x3f   : > { %1524 = vmatprep.mubr.msk.f32.mxu0 %vm253_vm3, %v205_v43 }
  0x40   : > { %1570 = vmatmul.mubr.msk.f32.gmra.mrb[18].mxu1 %vm253_vm3, %v236_v50 }
  0x41   : > { %1572 = vmatprep.mubr.msk.f32.mxu1 %vm253_vm3, %v237_v52 }
  0x42   : > { %1525 = vmatmul.mubr.msk.f32.gmra.mrb[20].mxu0 %vm253_vm3, %v206_v45 }
  0x43   : > { %1527 = vmatprep.mubr.msk.f32.mxu0 %vm253_vm3, %v207_v47 }
  0x44   : > { %1573 = vmatmul.mubr.msk.f32.gmra.mrb[20].mxu1 %vm253_vm3, %v238_v54 }
  0x45   : > { %1575 = vmatprep.mubr.msk.f32.mxu1 %vm253_vm3, %v239_v56 }
  0x46   : > { %1528 = vmatmul.mubr.msk.f32.gmra.mrb[22].mxu0 %vm253_vm3, %v208_v49 }
  0x47   : > { %1530 = vmatprep.mubr.msk.f32.mxu0 %vm253_vm3, %v209_v51 }
  0x48   : > { %1576 = vmatmul.mubr.msk.f32.gmra.mrb[22].mxu1 %vm253_vm3, %v240_v58 }
  0x49   : > { %1578 = vmatprep.mubr.msk.f32.mxu1 %vm253_vm3, %v241_v60 }
  0x4a   : > { %1531 = vmatmul.mubr.msk.f32.gmra.mrb[24].mxu0 %vm253_vm3, %v210_v53 }
  0x4b   : > { %1533 = vmatprep.mubr.msk.f32.mxu0 %vm253_vm3, %v211_v55 }
  0x4c   : > { %1579 = vmatmul.mubr.msk.f32.gmra.mrb[24].mxu1 %vm253_vm3, %v242_v62 }
  0x4d   : > { %1581 = vmatprep.mubr.msk.f32.mxu1 %vm253_vm3, %v243_v0 }
  0x4e   : > { %1534 = vmatmul.mubr.msk.f32.gmra.mrb[26].mxu0 %vm253_vm3, %v212_v57 }
  0x4f   : > { %1536 = vmatprep.mubr.msk.f32.mxu0 %vm253_vm3, %v213_v59 }
  0x50   : > { %1582 = vmatmul.mubr.msk.f32.gmra.mrb[26].mxu1 %vm253_vm3, %v244_v2 }
  0x51   : > { %1584 = vmatprep.mubr.msk.f32.mxu1 %vm253_vm3, %v245_v3 }
  0x52   : > { %1537 = vmatmul.mubr.msk.f32.gmra.mrb[28].mxu0 %vm253_vm3, %v214_v61 }
  0x53   : > { %1539 = vmatprep.mubr.msk.f32.mxu0 %vm253_vm3, %v215_v63 }
  0x54   : > { %1585 = vmatmul.mubr.msk.f32.gmra.mrb[28].mxu1 %vm253_vm3, %v246_v4 }
  0x55   : > { %1587 = vmatprep.mubr.msk.f32.mxu1 %vm253_vm3, %v247_v5 }
  0x56   : > { %1540 = vmatmul.mubr.msk.f32.gmra.mrb[30].mxu0 %vm253_vm3, %v216_v1 }
  0x58   : > { %1588 = vmatmul.mubr.msk.f32.gmra.mrb[30].mxu1 %vm253_vm3, %v248_v6 }
  0xed   : > { %v1496_v7 = vpop.f32.mrb[0].mxu0 }
  0xee   : > { %837 = vst.msk [vmem:[%s1946_s17 + $0x8] sm:$0xff] %vm835_vm4, %v1496_v7  ;;  %v901_v8 = vsel %vm835_vm4, %v1496_v7, 0.0  ;;  %v1036_v9 = vmul.f32 %v1496_v7, %v1496_v7  ;;  %v516_v10 = vpop.f32.mrb[1].mxu0 }
  0xef   : > { %836 = vst.msk [vmem:[%s1946_s17] sm:$0xff] %vm835_vm4, %v516_v10  ;;  %v900_v11 = vsel %vm835_vm4, %v516_v10, 0.0  ;;  %v1035_v12 = vmul.f32 %v516_v10, %v516_v10  ;;  %v1963_v26 = vpop.f32.mrb[0].mxu1 }
  0xf0   : > { %v1100_v13 = vsel %vm835_vm4, %v1036_v9, 0.0  ;;  %v902_v14 = vadd.f32 %v901_v8, %v900_v11  ;;  %869 = vst.msk [vmem:[%s1946_s17 + $0x108] sm:$0xff] %vm835_vm4, %v1963_v26  ;;  %v1970_v30 = vpop.f32.mrb[1].mxu1 }
  0xf1   : > { %v1099_v15 = vsel %vm835_vm4, %v1035_v12, 0.0  ;;  %v1499_v16 = vpop.f32.mrb[2].mxu0  ;;  %868 = vst.msk [vmem:[%s1946_s17 + $0x100] sm:$0xff] %vm835_vm4, %v1970_v30 }
  0xf2   : > { %v1101_v17 = vadd.f32 %v1100_v13, %v1099_v15  ;;  %839 = vst.msk [vmem:[%s1946_s17 + $0x18] sm:$0xff] %vm835_vm4, %v1499_v16  ;;  %v526_v18 = vpop.f32.mrb[3].mxu0  ;;  %v1038_v19 = vmul.f32 %v1499_v16, %v1499_v16  ;;  %v905_v23 = vsel %vm835_vm4, %v1499_v16, 0.0 }
  0xf3   : > { %838 = vst.msk [vmem:[%s1946_s17 + $0x10] sm:$0xff] %vm835_vm4, %v526_v18  ;;  %v903_v20 = vsel %vm835_vm4, %v526_v18, 0.0  ;;  %v1037_v21 = vmul.f32 %v526_v18, %v526_v18  ;;  %v1981_v40 = vpop.f32.mrb[2].mxu1 }
  0xf4   : > { %v904_v22 = vadd.f32 %v903_v20, %v902_v14  ;;  %v1104_v31 = vsel %vm835_vm4, %v1038_v19, 0.0  ;;  %871 = vst.msk [vmem:[%s1946_s17 + $0x118] sm:$0xff] %vm835_vm4, %v1981_v40  ;;  %v1988_v44 = vpop.f32.mrb[3].mxu1 }
  0xf5   : > { %v1102_v24 = vsel %vm835_vm4, %v1037_v21, 0.0  ;;  %v1502_v25 = vpop.f32.mrb[4].mxu0  ;;  %870 = vst.msk [vmem:[%s1946_s17 + $0x110] sm:$0xff] %vm835_vm4, %v1988_v44 }
  0xf6   : > { %v1103_v27 = vadd.f32 %v1102_v24, %v1101_v17  ;;  %841 = vst.msk [vmem:[%s1946_s17 + $0x28] sm:$0xff] %vm835_vm4, %v1502_v25  ;;  %v536_v28 = vpop.f32.mrb[5].mxu0  ;;  %v906_v29 = vadd.f32 %v905_v23, %v904_v22  ;;  %v1040_v32 = vmul.f32 %v1502_v25, %v1502_v25  ;;  %v909_v37 = vsel %vm835_vm4, %v1502_v25, 0.0 }
  0xf7   : > { %840 = vst.msk [vmem:[%s1946_s17 + $0x20] sm:$0xff] %vm835_vm4, %v536_v28  ;;  %v907_v33 = vsel %vm835_vm4, %v536_v28, 0.0  ;;  %v1039_v34 = vmul.f32 %v536_v28, %v536_v28  ;;  %v1999_v54 = vpop.f32.mrb[4].mxu1 }
  0xf8   : > { %v908_v35 = vadd.f32 %v907_v33, %v906_v29  ;;  %v1105_v36 = vadd.f32 %v1104_v31, %v1103_v27  ;;  %v1108_v45 = vsel %vm835_vm4, %v1040_v32, 0.0  ;;  %873 = vst.msk [vmem:[%s1946_s17 + $0x128] sm:$0xff] %vm835_vm4, %v1999_v54  ;;  %v2006_v58 = vpop.f32.mrb[5].mxu1 }
  0xf9   : > { %v1106_v38 = vsel %vm835_vm4, %v1039_v34, 0.0  ;;  %v1505_v39 = vpop.f32.mrb[6].mxu0  ;;  %872 = vst.msk [vmem:[%s1946_s17 + $0x120] sm:$0xff] %vm835_vm4, %v2006_v58 }
  0xfa   : > { %v1107_v41 = vadd.f32 %v1106_v38, %v1105_v36  ;;  %843 = vst.msk [vmem:[%s1946_s17 + $0x38] sm:$0xff] %vm835_vm4, %v1505_v39  ;;  %v546_v42 = vpop.f32.mrb[7].mxu0  ;;  %v910_v43 = vadd.f32 %v909_v37, %v908_v35  ;;  %v1042_v46 = vmul.f32 %v1505_v39, %v1505_v39  ;;  %v913_v51 = vsel %vm835_vm4, %v1505_v39, 0.0 }
  0xfb   : > { %842 = vst.msk [vmem:[%s1946_s17 + $0x30] sm:$0xff] %vm835_vm4, %v546_v42  ;;  %v911_v47 = vsel %vm835_vm4, %v546_v42, 0.0  ;;  %v1041_v48 = vmul.f32 %v546_v42, %v546_v42  ;;  %v2017_v4 = vpop.f32.mrb[6].mxu1 }
  0xfc   : > { %v912_v49 = vadd.f32 %v911_v47, %v910_v43  ;;  %v1109_v50 = vadd.f32 %v1108_v45, %v1107_v41  ;;  %v1112_v59 = vsel %vm835_vm4, %v1042_v46, 0.0  ;;  %875 = vst.msk [vmem:[%s1946_s17 + $0x138] sm:$0xff] %vm835_vm4, %v2017_v4  ;;  %v2024_v8 = vpop.f32.mrb[7].mxu1 }
  0xfd   : > { %v1110_v52 = vsel %vm835_vm4, %v1041_v48, 0.0  ;;  %v1508_v53 = vpop.f32.mrb[8].mxu0  ;;  %874 = vst.msk [vmem:[%s1946_s17 + $0x130] sm:$0xff] %vm835_vm4, %v2024_v8 }
  0xfe   : > { %v1111_v55 = vadd.f32 %v1110_v52, %v1109_v50  ;;  %845 = vst.msk [vmem:[%s1946_s17 + $0x48] sm:$0xff] %vm835_vm4, %v1508_v53  ;;  %v556_v56 = vpop.f32.mrb[9].mxu0  ;;  %v914_v57 = vadd.f32 %v913_v51, %v912_v49  ;;  %v1044_v60 = vmul.f32 %v1508_v53, %v1508_v53  ;;  %v917_v1 = vsel %vm835_vm4, %v1508_v53, 0.0 }
  0xff   : > { %844 = vst.msk [vmem:[%s1946_s17 + $0x40] sm:$0xff] %vm835_vm4, %v556_v56  ;;  %v915_v61 = vsel %vm835_vm4, %v556_v56, 0.0  ;;  %v1043_v62 = vmul.f32 %v556_v56, %v556_v56  ;;  %v2035_v18 = vpop.f32.mrb[8].mxu1 }
 0x100   : > { %v916_v63 = vadd.f32 %v915_v61, %v914_v57  ;;  %v1113_v0 = vadd.f32 %v1112_v59, %v1111_v55  ;;  %v1116_v9 = vsel %vm835_vm4, %v1044_v60, 0.0  ;;  %877 = vst.msk [vmem:[%s1946_s17 + $0x148] sm:$0xff] %vm835_vm4, %v2035_v18  ;;  %v2042_v22 = vpop.f32.mrb[9].mxu1 }
 0x101   : > { %v1114_v2 = vsel %vm835_vm4, %v1043_v62, 0.0  ;;  %v1511_v3 = vpop.f32.mrb[10].mxu0  ;;  %876 = vst.msk [vmem:[%s1946_s17 + $0x140] sm:$0xff] %vm835_vm4, %v2042_v22 }
 0x102   : > { %v1115_v5 = vadd.f32 %v1114_v2, %v1113_v0  ;;  %847 = vst.msk [vmem:[%s1946_s17 + $0x58] sm:$0xff] %vm835_vm4, %v1511_v3  ;;  %v566_v6 = vpop.f32.mrb[11].mxu0  ;;  %v918_v7 = vadd.f32 %v917_v1, %v916_v63  ;;  %v1046_v10 = vmul.f32 %v1511_v3, %v1511_v3  ;;  %v921_v15 = vsel %vm835_vm4, %v1511_v3, 0.0 }
 0x103   : > { %846 = vst.msk [vmem:[%s1946_s17 + $0x50] sm:$0xff] %vm835_vm4, %v566_v6  ;;  %v919_v11 = vsel %vm835_vm4, %v566_v6, 0.0  ;;  %v1045_v12 = vmul.f32 %v566_v6, %v566_v6  ;;  %v2053_v34 = vpop.f32.mrb[10].mxu1 }
 0x104   : > { %v920_v13 = vadd.f32 %v919_v11, %v918_v7  ;;  %v1117_v14 = vadd.f32 %v1116_v9, %v1115_v5  ;;  %v1120_v23 = vsel %vm835_vm4, %v1046_v10, 0.0  ;;  %879 = vst.msk [vmem:[%s1946_s17 + $0x158] sm:$0xff] %vm835_vm4, %v2053_v34  ;;  %v2060_v38 = vpop.f32.mrb[11].mxu1 }
 0x105   : > { %v1118_v16 = vsel %vm835_vm4, %v1045_v12, 0.0  ;;  %v1514_v17 = vpop.f32.mrb[12].mxu0  ;;  %878 = vst.msk [vmem:[%s1946_s17 + $0x150] sm:$0xff] %vm835_vm4, %v2060_v38 }
 0x106   : > { %v1119_v19 = vadd.f32 %v1118_v16, %v1117_v14  ;;  %849 = vst.msk [vmem:[%s1946_s17 + $0x68] sm:$0xff] %vm835_vm4, %v1514_v17  ;;  %v576_v20 = vpop.f32.mrb[13].mxu0  ;;  %v922_v21 = vadd.f32 %v921_v15, %v920_v13  ;;  %v1048_v24 = vmul.f32 %v1514_v17, %v1514_v17  ;;  %v925_v31 = vsel %vm835_vm4, %v1514_v17, 0.0 }
 0x107   : > { %848 = vst.msk [vmem:[%s1946_s17 + $0x60] sm:$0xff] %vm835_vm4, %v576_v20  ;;  %v923_v25 = vsel %vm835_vm4, %v576_v20, 0.0  ;;  %v1047_v27 = vmul.f32 %v576_v20, %v576_v20  ;;  %v2071_v50 = vpop.f32.mrb[12].mxu1 }
 0x108   : > { %v924_v28 = vadd.f32 %v923_v25, %v922_v21  ;;  %v1121_v29 = vadd.f32 %v1120_v23, %v1119_v19  ;;  %v1124_v39 = vsel %vm835_vm4, %v1048_v24, 0.0  ;;  %881 = vst.msk [vmem:[%s1946_s17 + $0x168] sm:$0xff] %vm835_vm4, %v2071_v50  ;;  %v2078_v55 = vpop.f32.mrb[13].mxu1 }
 0x109   : > { %v1122_v32 = vsel %vm835_vm4, %v1047_v27, 0.0  ;;  %v1517_v33 = vpop.f32.mrb[14].mxu0  ;;  %880 = vst.msk [vmem:[%s1946_s17 + $0x160] sm:$0xff] %vm835_vm4, %v2078_v55 }
 0x10a   : > { %v1123_v35 = vadd.f32 %v1122_v32, %v1121_v29  ;;  %851 = vst.msk [vmem:[%s1946_s17 + $0x78] sm:$0xff] %vm835_vm4, %v1517_v33  ;;  %v586_v36 = vpop.f32.mrb[15].mxu0  ;;  %v926_v37 = vadd.f32 %v925_v31, %v924_v28  ;;  %v1050_v41 = vmul.f32 %v1517_v33, %v1517_v33  ;;  %v929_v47 = vsel %vm835_vm4, %v1517_v33, 0.0 }
 0x10b   : > { %850 = vst.msk [vmem:[%s1946_s17 + $0x70] sm:$0xff] %vm835_vm4, %v586_v36  ;;  %v927_v42 = vsel %vm835_vm4, %v586_v36, 0.0  ;;  %v1049_v43 = vmul.f32 %v586_v36, %v586_v36  ;;  %v2089_v2 = vpop.f32.mrb[14].mxu1 }
 0x10c   : > { %v928_v45 = vadd.f32 %v927_v42, %v926_v37  ;;  %v1125_v46 = vadd.f32 %v1124_v39, %v1123_v35  ;;  %v1128_v56 = vsel %vm835_vm4, %v1050_v41, 0.0  ;;  %883 = vst.msk [vmem:[%s1946_s17 + $0x178] sm:$0xff] %vm835_vm4, %v2089_v2  ;;  %v2096_v7 = vpop.f32.mrb[15].mxu1 }
 0x10d   : > { %v1126_v48 = vsel %vm835_vm4, %v1049_v43, 0.0  ;;  %v1520_v49 = vpop.f32.mrb[16].mxu0  ;;  %882 = vst.msk [vmem:[%s1946_s17 + $0x170] sm:$0xff] %vm835_vm4, %v2096_v7 }
 0x10e   : > { %v1127_v51 = vadd.f32 %v1126_v48, %v1125_v46  ;;  %853 = vst.msk [vmem:[%s1946_s17 + $0x88] sm:$0xff] %vm835_vm4, %v1520_v49  ;;  %v596_v52 = vpop.f32.mrb[17].mxu0  ;;  %v930_v53 = vadd.f32 %v929_v47, %v928_v45  ;;  %v1052_v57 = vmul.f32 %v1520_v49, %v1520_v49  ;;  %v933_v63 = vsel %vm835_vm4, %v1520_v49, 0.0 }
 0x10f   : > { %852 = vst.msk [vmem:[%s1946_s17 + $0x80] sm:$0xff] %vm835_vm4, %v596_v52  ;;  %v931_v59 = vsel %vm835_vm4, %v596_v52, 0.0  ;;  %v1051_v60 = vmul.f32 %v596_v52, %v596_v52  ;;  %v2107_v19 = vpop.f32.mrb[16].mxu1 }
 0x110   : > { %v932_v61 = vadd.f32 %v931_v59, %v930_v53  ;;  %v1129_v62 = vadd.f32 %v1128_v56, %v1127_v51  ;;  %v1132_v9 = vsel %vm835_vm4, %v1052_v57, 0.0  ;;  %885 = vst.msk [vmem:[%s1946_s17 + $0x188] sm:$0xff] %vm835_vm4, %v2107_v19  ;;  %v2114_v24 = vpop.f32.mrb[17].mxu1 }
 0x111   : > { %v1130_v0 = vsel %vm835_vm4, %v1051_v60, 0.0  ;;  %v1523_v1 = vpop.f32.mrb[18].mxu0  ;;  %884 = vst.msk [vmem:[%s1946_s17 + $0x180] sm:$0xff] %vm835_vm4, %v2114_v24 }
 0x112   : > { %v1131_v3 = vadd.f32 %v1130_v0, %v1129_v62  ;;  %855 = vst.msk [vmem:[%s1946_s17 + $0x98] sm:$0xff] %vm835_vm4, %v1523_v1  ;;  %v606_v5 = vpop.f32.mrb[19].mxu0  ;;  %v934_v6 = vadd.f32 %v933_v63, %v932_v61  ;;  %v1054_v10 = vmul.f32 %v1523_v1, %v1523_v1  ;;  %v937_v15 = vsel %vm835_vm4, %v1523_v1, 0.0 }
 0x113   : > { %854 = vst.msk [vmem:[%s1946_s17 + $0x90] sm:$0xff] %vm835_vm4, %v606_v5  ;;  %v935_v11 = vsel %vm835_vm4, %v606_v5, 0.0  ;;  %v1053_v12 = vmul.f32 %v606_v5, %v606_v5  ;;  %v2125_v37 = vpop.f32.mrb[18].mxu1 }
 0x114   : > { %v936_v13 = vadd.f32 %v935_v11, %v934_v6  ;;  %v1133_v14 = vadd.f32 %v1132_v9, %v1131_v3  ;;  %v1136_v25 = vsel %vm835_vm4, %v1054_v10, 0.0  ;;  %887 = vst.msk [vmem:[%s1946_s17 + $0x198] sm:$0xff] %vm835_vm4, %v2125_v37  ;;  %v2132_v43 = vpop.f32.mrb[19].mxu1 }
 0x115   : > { %v1134_v16 = vsel %vm835_vm4, %v1053_v12, 0.0  ;;  %v1526_v17 = vpop.f32.mrb[20].mxu0  ;;  %886 = vst.msk [vmem:[%s1946_s17 + $0x190] sm:$0xff] %vm835_vm4, %v2132_v43 }
 0x116   : > { %v1135_v20 = vadd.f32 %v1134_v16, %v1133_v14  ;;  %857 = vst.msk [vmem:[%s1946_s17 + $0xa8] sm:$0xff] %vm835_vm4, %v1526_v17  ;;  %v616_v21 = vpop.f32.mrb[21].mxu0  ;;  %v938_v23 = vadd.f32 %v937_v15, %v936_v13  ;;  %v1056_v27 = vmul.f32 %v1526_v17, %v1526_v17  ;;  %v941_v33 = vsel %vm835_vm4, %v1526_v17, 0.0 }
 0x117   : > { %856 = vst.msk [vmem:[%s1946_s17 + $0xa0] sm:$0xff] %vm835_vm4, %v616_v21  ;;  %v939_v28 = vsel %vm835_vm4, %v616_v21, 0.0  ;;  %v1055_v29 = vmul.f32 %v616_v21, %v616_v21  ;;  %v2143_v57 = vpop.f32.mrb[20].mxu1 }
 0x118   : > { %v940_v31 = vadd.f32 %v939_v28, %v938_v23  ;;  %v1137_v32 = vadd.f32 %v1136_v25, %v1135_v20  ;;  %v1140_v45 = vsel %vm835_vm4, %v1056_v27, 0.0  ;;  %889 = vst.msk [vmem:[%s1946_s17 + $0x1a8] sm:$0xff] %vm835_vm4, %v2143_v57  ;;  %v2150_v62 = vpop.f32.mrb[21].mxu1 }
 0x119   : > { %v1138_v35 = vsel %vm835_vm4, %v1055_v29, 0.0  ;;  %v1529_v36 = vpop.f32.mrb[22].mxu0  ;;  %888 = vst.msk [vmem:[%s1946_s17 + $0x1a0] sm:$0xff] %vm835_vm4, %v2150_v62 }
 0x11a   : > { %v1139_v39 = vadd.f32 %v1138_v35, %v1137_v32  ;;  %859 = vst.msk [vmem:[%s1946_s17 + $0xb8] sm:$0xff] %vm835_vm4, %v1529_v36  ;;  %v626_v41 = vpop.f32.mrb[23].mxu0  ;;  %v942_v42 = vadd.f32 %v941_v33, %v940_v31  ;;  %v1058_v46 = vmul.f32 %v1529_v36, %v1529_v36  ;;  %v945_v52 = vsel %vm835_vm4, %v1529_v36, 0.0 }
 0x11b   : > { %858 = vst.msk [vmem:[%s1946_s17 + $0xb0] sm:$0xff] %vm835_vm4, %v626_v41  ;;  %v943_v47 = vsel %vm835_vm4, %v626_v41, 0.0  ;;  %v1057_v48 = vmul.f32 %v626_v41, %v626_v41  ;;  %v2161_v12 = vpop.f32.mrb[22].mxu1 }
 0x11c   : > { %v944_v49 = vadd.f32 %v943_v47, %v942_v42  ;;  %v1141_v51 = vadd.f32 %v1140_v45, %v1139_v39  ;;  %v1144_v63 = vsel %vm835_vm4, %v1058_v46, 0.0  ;;  %891 = vst.msk [vmem:[%s1946_s17 + $0x1b8] sm:$0xff] %vm835_vm4, %v2161_v12  ;;  %v2168_v16 = vpop.f32.mrb[23].mxu1 }
 0x11d   : > { %v1142_v53 = vsel %vm835_vm4, %v1057_v48, 0.0  ;;  %v1532_v56 = vpop.f32.mrb[24].mxu0  ;;  %890 = vst.msk [vmem:[%s1946_s17 + $0x1b0] sm:$0xff] %vm835_vm4, %v2168_v16 }
 0x11e   : > { %v1143_v59 = vadd.f32 %v1142_v53, %v1141_v51  ;;  %861 = vst.msk [vmem:[%s1946_s17 + $0xc8] sm:$0xff] %vm835_vm4, %v1532_v56  ;;  %v636_v60 = vpop.f32.mrb[25].mxu0  ;;  %v946_v61 = vadd.f32 %v945_v52, %v944_v49  ;;  %v1060_v0 = vmul.f32 %v1532_v56, %v1532_v56  ;;  %v949_v9 = vsel %vm835_vm4, %v1532_v56, 0.0 }
 0x11f   : > { %860 = vst.msk [vmem:[%s1946_s17 + $0xc0] sm:$0xff] %vm835_vm4, %v636_v60  ;;  %v947_v1 = vsel %vm835_vm4, %v636_v60, 0.0  ;;  %v1059_v3 = vmul.f32 %v636_v60, %v636_v60  ;;  %v2179_v32 = vpop.f32.mrb[24].mxu1 }
 0x120   : > { %v948_v5 = vadd.f32 %v947_v1, %v946_v61  ;;  %v1145_v6 = vadd.f32 %v1144_v63, %v1143_v59  ;;  %v1148_v17 = vsel %vm835_vm4, %v1060_v0, 0.0  ;;  %893 = vst.msk [vmem:[%s1946_s17 + $0x1c8] sm:$0xff] %vm835_vm4, %v2179_v32  ;;  %v2186_v39 = vpop.f32.mrb[25].mxu1  ;;  %v1067_v61 = vmul.f32 %v1970_v30, %v1970_v30 }
 0x121   : > { %v1146_v10 = vsel %vm835_vm4, %v1059_v3, 0.0  ;;  %v1535_v11 = vpop.f32.mrb[26].mxu0  ;;  %892 = vst.msk [vmem:[%s1946_s17 + $0x1c0] sm:$0xff] %vm835_vm4, %v2186_v39 }
 0x122   : > { %v1147_v13 = vadd.f32 %v1146_v10, %v1145_v6  ;;  %863 = vst.msk [vmem:[%s1946_s17 + $0xd8] sm:$0xff] %vm835_vm4, %v1535_v11  ;;  %v646_v14 = vpop.f32.mrb[27].mxu0  ;;  %v950_v15 = vadd.f32 %v949_v9, %v948_v5  ;;  %v1062_v20 = vmul.f32 %v1535_v11, %v1535_v11  ;;  %v953_v28 = vsel %vm835_vm4, %v1535_v11, 0.0 }
 0x123   : > { %862 = vst.msk [vmem:[%s1946_s17 + $0xd0] sm:$0xff] %vm835_vm4, %v646_v14  ;;  %v951_v21 = vsel %vm835_vm4, %v646_v14, 0.0  ;;  %v1061_v23 = vmul.f32 %v646_v14, %v646_v14  ;;  %v2197_v53 = vpop.f32.mrb[26].mxu1 }
 0x124   : > { %v952_v25 = vadd.f32 %v951_v21, %v950_v15  ;;  %v1149_v27 = vadd.f32 %v1148_v17, %v1147_v13  ;;  %v1152_v41 = vsel %vm835_vm4, %v1062_v20, 0.0  ;;  %895 = vst.msk [vmem:[%s1946_s17 + $0x1d8] sm:$0xff] %vm835_vm4, %v2197_v53  ;;  %v2206_v63 = vpop.f32.mrb[27].mxu1  ;;  %v963_v13 = vsel %vm835_vm4, %v1970_v30, 0.0 }
 0x125   : > { %v1150_v29 = vsel %vm835_vm4, %v1061_v23, 0.0  ;;  %v1538_v31 = vpop.f32.mrb[28].mxu0  ;;  %894 = vst.msk [vmem:[%s1946_s17 + $0x1d0] sm:$0xff] %vm835_vm4, %v2206_v63  ;;  %v1068_v23 = vmul.f32 %v1963_v26, %v1963_v26  ;;  %v1069_v30 = vmul.f32 %v1988_v44, %v1988_v44 }
 0x126   : > { %v1151_v33 = vadd.f32 %v1150_v29, %v1149_v27  ;;  %865 = vst.msk [vmem:[%s1946_s17 + $0xe8] sm:$0xff] %vm835_vm4, %v1538_v31  ;;  %v656_v35 = vpop.f32.mrb[29].mxu0  ;;  %v954_v36 = vadd.f32 %v953_v28, %v952_v25  ;;  %v1064_v42 = vmul.f32 %v1538_v31, %v1538_v31  ;;  %v957_v49 = vsel %vm835_vm4, %v1538_v31, 0.0 }
 0x127   : > { %864 = vst.msk [vmem:[%s1946_s17 + $0xe0] sm:$0xff] %vm835_vm4, %v656_v35  ;;  %v955_v45 = vsel %vm835_vm4, %v656_v35, 0.0  ;;  %v1063_v46 = vmul.f32 %v656_v35, %v656_v35  ;;  %v2219_v14 = vpop.f32.mrb[28].mxu1  ;;  %v1162_v25 = vsel %vm835_vm4, %v1067_v61, 0.0  ;;  %v965_v29 = vsel %vm835_vm4, %v1963_v26, 0.0 }
 0x128   : > { %v956_v47 = vadd.f32 %v955_v45, %v954_v36  ;;  %v1153_v48 = vadd.f32 %v1152_v41, %v1151_v33  ;;  %v1156_v0 = vsel %vm835_vm4, %v1064_v42, 0.0  ;;  %897 = vst.msk [vmem:[%s1946_s17 + $0x1e8] sm:$0xff] %vm835_vm4, %v2219_v14  ;;  %v2224_v20 = vpop.f32.mrb[29].mxu1  ;;  %v967_v31 = vsel %vm835_vm4, %v1988_v44, 0.0 }
 0x129   : > { %v1154_v51 = vsel %vm835_vm4, %v1063_v46, 0.0  ;;  %v1541_v52 = vpop.f32.mrb[30].mxu0  ;;  %896 = vst.msk [vmem:[%s1946_s17 + $0x1e0] sm:$0xff] %vm835_vm4, %v2224_v20  ;;  %v1164_v42 = vsel %vm835_vm4, %v1068_v23, 0.0  ;;  %v1070_v45 = vmul.f32 %v1981_v40, %v1981_v40  ;;  %v1166_v46 = vsel %vm835_vm4, %v1069_v30, 0.0 }
 0x12a   : > { %v1155_v56 = vadd.f32 %v1154_v51, %v1153_v48  ;;  %867 = vst.msk [vmem:[%s1946_s17 + $0xf8] sm:$0xff] %vm835_vm4, %v1541_v52  ;;  %v666_v59 = vpop.f32.mrb[31].mxu0  ;;  %v958_v60 = vadd.f32 %v957_v49, %v956_v47  ;;  %v1066_v1 = vmul.f32 %v1541_v52, %v1541_v52  ;;  %v961_v10 = vsel %vm835_vm4, %v1541_v52, 0.0 }
 0x12b   : > { %866 = vst.msk [vmem:[%s1946_s17 + $0xf0] sm:$0xff] %vm835_vm4, %v666_v59  ;;  %v959_v3 = vsel %vm835_vm4, %v666_v59, 0.0  ;;  %v1065_v5 = vmul.f32 %v666_v59, %v666_v59  ;;  %v2239_v33 = vpop.f32.mrb[30].mxu1  ;;  %v1071_v26 = vmul.f32 %v2006_v58, %v2006_v58  ;;  %v969_v48 = vsel %vm835_vm4, %v1981_v40, 0.0 }
 0x12c   : > { %v960_v6 = vadd.f32 %v959_v3, %v958_v60  ;;  %v1157_v9 = vadd.f32 %v1156_v0, %v1155_v56  ;;  %v1160_v21 = vsel %vm835_vm4, %v1066_v1, 0.0  ;;  %899 = vst.msk [vmem:[%s1946_s17 + $0x1f8] sm:$0xff] %vm835_vm4, %v2239_v33  ;;  %v2244_v41 = vpop.f32.mrb[31].mxu1  ;;  %v971_v49 = vsel %vm835_vm4, %v2006_v58, 0.0 }
 0x12d   : > { %v1158_v11 = vsel %vm835_vm4, %v1065_v5, 0.0  ;;  %898 = vst.msk [vmem:[%s1946_s17 + $0x1f0] sm:$0xff] %vm835_vm4, %v2244_v41  ;;  %v1168_v56 = vsel %vm835_vm4, %v1070_v45, 0.0  ;;  %v1072_v59 = vmul.f32 %v1999_v54, %v1999_v54  ;;  %v1170_v60 = vsel %vm835_vm4, %v1071_v26, 0.0 }
 0x12e   : > { %v962_v15 = vadd.f32 %v961_v10, %v960_v6  ;;  %v1159_v17 = vadd.f32 %v1158_v11, %v1157_v9  ;;  %v1073_v61 = vmul.f32 %v2024_v8, %v2024_v8  ;;  %v973_v40 = vsel %vm835_vm4, %v1999_v54, 0.0 }
 0x12f   : > { %v975_v58 = vsel %vm835_vm4, %v2024_v8, 0.0  ;;  %v1172_v6 = vsel %vm835_vm4, %v1072_v59, 0.0  ;;  %v1074_v9 = vmul.f32 %v2017_v4, %v2017_v4  ;;  %v1075_v11 = vmul.f32 %v2042_v22, %v2042_v22 }
 0x130   : > { %v1161_v27 = vadd.f32 %v1160_v21, %v1159_v17  ;;  %v964_v28 = vadd.f32 %v963_v13, %v962_v15  ;;  %v1174_v10 = vsel %vm835_vm4, %v1073_v61, 0.0  ;;  %v977_v54 = vsel %vm835_vm4, %v2017_v4, 0.0 }
 0x131   : > { %v979_v8 = vsel %vm835_vm4, %v2042_v22, 0.0  ;;  %v1176_v23 = vsel %vm835_vm4, %v1074_v9, 0.0  ;;  %v1178_v30 = vsel %vm835_vm4, %v1075_v11, 0.0  ;;  %v981_v4 = vsel %vm835_vm4, %v2035_v18, 0.0 }
 0x132   : > { %v1163_v35 = vadd.f32 %v1162_v25, %v1161_v27  ;;  %v966_v36 = vadd.f32 %v965_v29, %v964_v28  ;;  %v1076_v25 = vmul.f32 %v2035_v18, %v2035_v18  ;;  %v1077_v27 = vmul.f32 %v2060_v38, %v2060_v38 }
 0x133   : > { %v983_v22 = vsel %vm835_vm4, %v2060_v38, 0.0  ;;  %v985_v18 = vsel %vm835_vm4, %v2053_v34, 0.0  ;;  %v987_v38 = vsel %vm835_vm4, %v2078_v55, 0.0 }
 0x134   : > { %v968_v44 = vadd.f32 %v967_v31, %v966_v36  ;;  %v1165_v47 = vadd.f32 %v1164_v42, %v1163_v35  ;;  %v1180_v36 = vsel %vm835_vm4, %v1076_v25, 0.0  ;;  %v1078_v42 = vmul.f32 %v2053_v34, %v2053_v34 }
 0x135   : > { %v1182_v45 = vsel %vm835_vm4, %v1077_v27, 0.0  ;;  %v989_v34 = vsel %vm835_vm4, %v2071_v50, 0.0 }
 0x136   : > { %v1167_v51 = vadd.f32 %v1166_v46, %v1165_v47  ;;  %v970_v52 = vadd.f32 %v969_v48, %v968_v44  ;;  %v1079_v46 = vmul.f32 %v2078_v55, %v2078_v55  ;;  %v991_v55 = vsel %vm835_vm4, %v2096_v7, 0.0 }
 0x138   : > { %v972_v0 = vadd.f32 %v971_v49, %v970_v52  ;;  %v1169_v1 = vadd.f32 %v1168_v56, %v1167_v51  ;;  %v1184_v49 = vsel %vm835_vm4, %v1078_v42, 0.0  ;;  %v1080_v51 = vmul.f32 %v2071_v50, %v2071_v50 }
 0x139   : > { %v1186_v52 = vsel %vm835_vm4, %v1079_v46, 0.0  ;;  %v1081_v56 = vmul.f32 %v2096_v7, %v2096_v7  ;;  %v993_v50 = vsel %vm835_vm4, %v2089_v2, 0.0  ;;  %v995_v7 = vsel %vm835_vm4, %v2114_v24, 0.0 }
 0x13a   : > { %v1171_v3 = vadd.f32 %v1170_v60, %v1169_v1  ;;  %v974_v5 = vadd.f32 %v973_v40, %v972_v0  ;;  %v1188_v1 = vsel %vm835_vm4, %v1080_v51, 0.0  ;;  %v1082_v40 = vmul.f32 %v2089_v2, %v2089_v2 }
 0x13b   : > { %v997_v2 = vsel %vm835_vm4, %v2107_v19, 0.0 }
 0x13c   : > { %v976_v13 = vadd.f32 %v975_v58, %v974_v5  ;;  %v1173_v15 = vadd.f32 %v1172_v6, %v1171_v3  ;;  %v1190_v58 = vsel %vm835_vm4, %v1081_v56, 0.0  ;;  %v1083_v3 = vmul.f32 %v2114_v24, %v2114_v24 }
 0x13d   : > { %v1192_v11 = vsel %vm835_vm4, %v1082_v40, 0.0  ;;  %v999_v24 = vsel %vm835_vm4, %v2132_v43, 0.0 }
 0x13e   : > { %v1175_v17 = vadd.f32 %v1174_v10, %v1173_v15  ;;  %v978_v21 = vadd.f32 %v977_v54, %v976_v13  ;;  %v1084_v13 = vmul.f32 %v2107_v19, %v2107_v19  ;;  %v1194_v15 = vsel %vm835_vm4, %v1083_v3, 0.0 }
 0x13f   : > { %v1085_v54 = vmul.f32 %v2132_v43, %v2132_v43  ;;  %v1001_v19 = vsel %vm835_vm4, %v2125_v37, 0.0  ;;  %v1003_v43 = vsel %vm835_vm4, %v2150_v62, 0.0 }
 0x140   : > { %v980_v28 = vadd.f32 %v979_v8, %v978_v21  ;;  %v1177_v29 = vadd.f32 %v1176_v23, %v1175_v17  ;;  %v1196_v25 = vsel %vm835_vm4, %v1084_v13, 0.0 }
 0x141   : > { %v1198_v27 = vsel %vm835_vm4, %v1085_v54, 0.0 }
 0x142   : > { %v1179_v31 = vadd.f32 %v1178_v30, %v1177_v29  ;;  %v982_v35 = vadd.f32 %v981_v4, %v980_v28  ;;  %v1086_v30 = vmul.f32 %v2125_v37, %v2125_v37  ;;  %v1087_v28 = vmul.f32 %v2150_v62, %v2150_v62 }
 0x143   : > { %v1005_v37 = vsel %vm835_vm4, %v2143_v57, 0.0  ;;  %v1007_v62 = vsel %vm835_vm4, %v2168_v16, 0.0 }
 0x144   : > { %v984_v26 = vadd.f32 %v983_v22, %v982_v35  ;;  %v1181_v44 = vadd.f32 %v1180_v36, %v1179_v31  ;;  %v1200_v35 = vsel %vm835_vm4, %v1086_v30, 0.0  ;;  %v1088_v36 = vmul.f32 %v2143_v57, %v2143_v57 }
 0x145   : > { %v1202_v42 = vsel %vm835_vm4, %v1087_v28, 0.0  ;;  %v1009_v57 = vsel %vm835_vm4, %v2161_v12, 0.0 }
 0x146   : > { %v1183_v47 = vadd.f32 %v1182_v45, %v1181_v44  ;;  %v986_v48 = vadd.f32 %v985_v18, %v984_v26  ;;  %v1089_v45 = vmul.f32 %v2168_v16, %v2168_v16  ;;  %v1011_v16 = vsel %vm835_vm4, %v2186_v39, 0.0 }
 0x148   : > { %v988_v59 = vadd.f32 %v987_v38, %v986_v48  ;;  %v1185_v60 = vadd.f32 %v1184_v49, %v1183_v47  ;;  %v1204_v38 = vsel %vm835_vm4, %v1088_v36, 0.0  ;;  %v1090_v47 = vmul.f32 %v2161_v12, %v2161_v12 }
 0x149   : > { %v1206_v48 = vsel %vm835_vm4, %v1089_v45, 0.0  ;;  %v1091_v49 = vmul.f32 %v2186_v39, %v2186_v39  ;;  %v1013_v12 = vsel %vm835_vm4, %v2179_v32, 0.0  ;;  %v1015_v39 = vsel %vm835_vm4, %v2206_v63, 0.0 }
 0x14a   : > { %v1187_v61 = vadd.f32 %v1186_v52, %v1185_v60  ;;  %v990_v0 = vadd.f32 %v989_v34, %v988_v59  ;;  %v1208_v60 = vsel %vm835_vm4, %v1090_v47, 0.0  ;;  %v1092_v34 = vmul.f32 %v2179_v32, %v2179_v32 }
 0x14b   : > { %v1017_v32 = vsel %vm835_vm4, %v2197_v53, 0.0 }
 0x14c   : > { %v992_v5 = vadd.f32 %v991_v55, %v990_v0  ;;  %v1189_v6 = vadd.f32 %v1188_v1, %v1187_v61  ;;  %v1210_v55 = vsel %vm835_vm4, %v1091_v49, 0.0  ;;  %v1093_v61 = vmul.f32 %v2206_v63, %v2206_v63 }
 0x14d   : > { %v1212_v3 = vsel %vm835_vm4, %v1092_v34, 0.0  ;;  %v1019_v63 = vsel %vm835_vm4, %v2224_v20, 0.0 }
 0x14e   : > { %v1191_v9 = vadd.f32 %v1190_v58, %v1189_v6  ;;  %v994_v10 = vadd.f32 %v993_v50, %v992_v5  ;;  %v1094_v5 = vmul.f32 %v2197_v53, %v2197_v53  ;;  %v1214_v6 = vsel %vm835_vm4, %v1093_v61, 0.0 }
 0x14f   : > { %v1095_v50 = vmul.f32 %v2224_v20, %v2224_v20  ;;  %v1021_v53 = vsel %vm835_vm4, %v2219_v14, 0.0  ;;  %v1023_v20 = vsel %vm835_vm4, %v2244_v41, 0.0 }
 0x150   : > { %v996_v8 = vadd.f32 %v995_v7, %v994_v10  ;;  %v1193_v17 = vadd.f32 %v1192_v11, %v1191_v9  ;;  %v1216_v13 = vsel %vm835_vm4, %v1094_v5, 0.0 }
 0x151   : > { %v1218_v54 = vsel %vm835_vm4, %v1095_v50, 0.0 }
 0x152   : > { %v1195_v21 = vadd.f32 %v1194_v15, %v1193_v17  ;;  %v998_v23 = vadd.f32 %v997_v2, %v996_v8  ;;  %v1096_v15 = vmul.f32 %v2219_v14, %v2219_v14  ;;  %v1097_v8 = vmul.f32 %v2244_v41, %v2244_v41 }
 0x154   : > { %v1000_v29 = vadd.f32 %v999_v24, %v998_v23  ;;  %v1197_v4 = vadd.f32 %v1196_v25, %v1195_v21  ;;  %v1220_v23 = vsel %vm835_vm4, %v1096_v15, 0.0  ;;  %v1098_v25 = vmul.f32 %v2239_v33, %v2239_v33 }
 0x155   : > { %v1222_v30 = vsel %vm835_vm4, %v1097_v8, 0.0 }
 0x156   : > { %v1199_v22 = vadd.f32 %v1198_v27, %v1197_v4  ;;  %v1002_v31 = vadd.f32 %v1001_v19, %v1000_v29  ;;  %v1025_v29 = vsel %vm835_vm4, %v2239_v33, 0.0  ;;  %v1224_v19 = vsel %vm835_vm4, %v1098_v25, 0.0 }
 0x158   : > { %v1004_v46 = vadd.f32 %v1003_v43, %v1002_v31  ;;  %v1201_v26 = vadd.f32 %v1200_v35, %v1199_v22 }
 0x15a   : > { %v1203_v44 = vadd.f32 %v1202_v42, %v1201_v26  ;;  %v1006_v18 = vadd.f32 %v1005_v37, %v1004_v46 }
 0x15c   : > { %v1008_v51 = vadd.f32 %v1007_v62, %v1006_v18  ;;  %v1205_v52 = vadd.f32 %v1204_v38, %v1203_v44 }
 0x15e   : > { %v1207_v56 = vadd.f32 %v1206_v48, %v1205_v52  ;;  %v1010_v59 = vadd.f32 %v1009_v57, %v1008_v51 }
 0x160   : > { %v1012_v0 = vadd.f32 %v1011_v16, %v1010_v59  ;;  %v1209_v1 = vadd.f32 %v1208_v60, %v1207_v56 }
 0x162   : > { %v1211_v40 = vadd.f32 %v1210_v55, %v1209_v1  ;;  %v1014_v58 = vadd.f32 %v1013_v12, %v1012_v0 }
 0x164   : > { %v1016_v7 = vadd.f32 %v1015_v39, %v1014_v58  ;;  %v1213_v9 = vadd.f32 %v1212_v3, %v1211_v40 }
 0x166   : > { %v1215_v10 = vadd.f32 %v1214_v6, %v1213_v9  ;;  %v1018_v11 = vadd.f32 %v1017_v32, %v1016_v7 }
 0x168   : > { %v1020_v17 = vadd.f32 %v1019_v63, %v1018_v11  ;;  %v1217_v2 = vadd.f32 %v1216_v13, %v1215_v10 }
 0x16a   : > { %v1219_v24 = vadd.f32 %v1218_v54, %v1217_v2  ;;  %v1022_v21 = vadd.f32 %v1021_v53, %v1020_v17 }
 0x16c   : > { %v1024_v27 = vadd.f32 %v1023_v20, %v1022_v21  ;;  %v1221_v28 = vadd.f32 %v1220_v23, %v1219_v24 }
 0x16e   : > { %v1026_v4 = vadd.f32 %v1025_v29, %v1024_v27  ;;  %v1223_v14 = vadd.f32 %v1222_v30, %v1221_v28 }
 0x170   : > { %v1027_v41 = vrot.slane %v1026_v4, 4  ;;  %v1225_v43 = vadd.f32 %v1224_v19, %v1223_v14 }
 0x172   : > { %v1028_v22 = vadd.f32 %v1027_v41, %v1026_v4  ;;  %v1226_v31 = vrot.slane %v1225_v43, 4 }
 0x174   : > { %v1029_v35 = vrot.slane %v1028_v22, 2  ;;  %v1227_v36 = vadd.f32 %v1226_v31, %v1225_v43 }
 0x176   : > { %v1030_v42 = vadd.f32 %v1029_v35, %v1028_v22  ;;  %v1228_v45 = vrot.slane %v1227_v36, 2 }
 0x178   : > { %v1031_v46 = vrot.slane %v1030_v42, 1  ;;  %v1229_v26 = vadd.f32 %v1228_v45, %v1227_v36 }
 0x17a   : > { %v1032_v33 = vadd.f32 %v1031_v46, %v1030_v42  ;;  %v1230_v37 = vrot.slane %v1229_v26, 1 }
 0x17c   : > { %1034 = vst.msk [vmem:[%s172_s25] sm:$0x1] %vm1033_vm5, %v1032_v33  ;;  %v1231_v62 = vadd.f32 %v1230_v37, %v1229_v26 }
 0x17e   : > { %1232 = vst.msk [vmem:[%s172_s25 + $0x1] sm:$0x1] %vm1033_vm5, %v1231_v62 }
 0x17f   : > { %1657 = shalt.err (!%p1654_p3)
}
 0x180   : > { %s1658_s7 = scalar_lea.hbm %s2401_s29, 32  ;;  %s1662_s10 = scalar_lea.hbm %s2446_s3, 64 }
 0x181   : > { %p1659_p4 = scmp.ne.s32.totalorder %s2401_s29, %s1658_s7  ;;  %p1663_p9 = scmp.lt.u32.totalorder %s2401_s29, %s2446_s3 }
 0x182   : > { %p1664_p10 = scmp.lt.u32.totalorder %s1662_s10, %s1658_s7  ;;  %p1666_p12 = scmp.lt.u32.totalorder %s1658_s7, %s2401_s29 }
 0x183   : > { %p1660_p7 = pnand %p1659_p4, %p1768_p5 }
 0x184   : > { %p1665_p11 = por %p1664_p10, %p1663_p9 }
 0x185   : > { %p1661_p8 = pneg %p1660_p7 }
 0x186   : > { %p1667_p13 = por %p1666_p12, %p1665_p11 }
 0x188   : > { %p1668_p0 = pnand %p1667_p13, %p1661_p8 }
 0x18a   : > { %1671 = shalt.err (!%p1668_p0)
}
 0x18b   : > { %1604 = dma.vmem_to_hbm [thread:$0]  (%p1768_p5), %s2403_s26, 32, %s2401_s29, %s1239_s30  }
 0x18c PF: > { %p1610_p1 = scmp.ge.s32.totalorder %s1706_s15, 2  ;;  %s1276_s19 = sand.u32 1, %s1694_s12  }
 0x18d   : > { %s1277_s20 = scalar_lea.sflag [#allocation3], %s1276_s19 }
 0x18e   : > { %p1607_p2 = pnand %p1610_p1, %p1772_p6 }
 0x190   : > { %1689 = dma.done.wait (!%p1607_p2), %s1277_s20, 32  }
 0x191   : > { %1691 = vsyncadd (!%p1607_p2), %s1277_s20, 4294967264  ;;  %p14_p3 = scmp.ge.s32.totalorder %s1755_s18, 4   ;;  %s2451_s12 = smov %s1698_s13 }
 0x192   : > { %s2452_s13 = smov %s1702_s14  ;;  %s2453_s14 = smov %s1766_s21 }
 0x193   : > { %s2454_s15 = smov %s1755_s18  ;;  %16 = sbr.rel (!%p14_p3) target bundleno = 3 (0x3), region = 75 }
 0x19a   :  { %1282 = vsyncpa [#allocation3], 1 }
 0x19b   :  { %1284 = vsyncpa [#allocation3 + $0x1], 1 }

</bundles_post_ra>
